<compile_context>
chip_gen: v7x
topology: tpu7x:2x2x1
jax: 0.10.0
libtpu: 0.0.40
codegen_flags: <defaults>
</compile_context>

<pallas_src>
import math
import functools
import numpy as np
import jax
import jax.numpy as jnp
from jax import lax
from jax.experimental import pallas as pl
from jax.experimental.pallas import tpu as pltpu

EPS = 1e-6


# ----------------------------- shared math helpers -------------------------- #

def _t_norm_ref(x, alpha, bias, eps=EPS):
    # torch Norm: alpha * (x - mean) / (std + eps) + bias ; std unbiased (ddof=1)
    d = x.shape[-1]
    mean = jnp.mean(x, axis=-1, keepdims=True)
    diff = x - mean
    var = jnp.sum(diff * diff, axis=-1, keepdims=True) / (d - 1)
    return alpha * diff / (jnp.sqrt(var) + eps) + bias


def _t_norm_kernel(x, alpha, bias, *, approx, eps=EPS):
    # Same math, but divide -> reciprocal multiply (EUP slot instead of VALU).
    d = x.shape[-1]
    mean = jnp.mean(x, axis=-1, keepdims=True)
    diff = x - mean
    var = jnp.sum(diff * diff, axis=-1, keepdims=True) * (1.0 / (d - 1))
    inv = pl.reciprocal(jnp.sqrt(var) + eps, approx=approx)
    return alpha * diff * inv + bias


# ------------------------------ Pallas kernel -------------------------------- #

def encoder_layer_kernel(*refs, heads, apply_pe, apply_final_norm,
                         compute_dtype, approx_recip):
    refs = list(refs)
    x_q_ref, x_f_ref = refs[0], refs[1]
    i = 2
    if apply_pe:
        pe_q_ref, pe_f_ref = refs[i], refs[i + 1]
        i += 2
    (n1a, n1b, n2a, n2b,
     wq, bq, wk, bk, wv, bv, wo, bo,
     w1, b1, w2, b2) = refs[i:i + 16]
    i += 16
    if apply_final_norm:
        fna, fnb = refs[i], refs[i + 1]
        i += 2
    o_ref, concat_ref = refs[i], refs[i + 1]

    def c(a):                       # cast matmul operands only; accumulate in f32
        return a.astype(compute_dtype)

    x_q = x_q_ref[0]                # (TQ, D) f32  (query-row tile)
    x_f = x_f_ref[0]                # (S,  D) f32  (full sequence, for K/V)
    TQ, D = x_q.shape
    d_k = D // heads

    if apply_pe:                    # fused PositionalEncoder (layer 0 only)
        scale = math.sqrt(D)
        x_q = x_q * scale + pe_q_ref[...]
        x_f = x_f * scale + pe_f_ref[...]

    # ---- sublayer 1: pre-norm + multi-head self-attention + residual ----
    x2_q = _t_norm_kernel(x_q, n1a[...], n1b[...], approx=approx_recip)
    x2_f = _t_norm_kernel(x_f, n1a[...], n1b[...], approx=approx_recip)

    q = jnp.dot(c(x2_q), c(wq[...]), preferred_element_type=jnp.float32) + bq[...]
    k = jnp.dot(c(x2_f), c(wk[...]), preferred_element_type=jnp.float32) + bk[...]
    v = jnp.dot(c(x2_f), c(wv[...]), preferred_element_type=jnp.float32) + bv[...]

    inv_sqrt_dk = 1.0 / math.sqrt(d_k)
    for h in range(heads):          # static unroll; heads written to scratch lanes
        sl = slice(h * d_k, (h + 1) * d_k)
        s = lax.dot_general(c(q[:, sl]), c(k[:, sl]), (((1,), (1,)), ((), ())),
                            preferred_element_type=jnp.float32) * inv_sqrt_dk
        s = s - jnp.max(s, axis=-1, keepdims=True)
        p = jnp.exp(s)
        p = p * pl.reciprocal(jnp.sum(p, axis=-1, keepdims=True),
                              approx=approx_recip)
        concat_ref[:, sl] = jnp.dot(
            c(p), c(v[:, sl]), preferred_element_type=jnp.float32
        ).astype(concat_ref.dtype)

    attn = jnp.dot(concat_ref[...], c(wo[...]),
                   preferred_element_type=jnp.float32) + bo[...]
    x_q = x_q + attn                # dropout_1 -> identity (eval)

    # ---- sublayer 2: pre-norm + feed-forward + residual ----
    x2 = _t_norm_kernel(x_q, n2a[...], n2b[...], approx=approx_recip)
    hdn = jnp.maximum(
        jnp.dot(c(x2), c(w1[...]), preferred_element_type=jnp.float32) + b1[...],
        0.0)
    ff = jnp.dot(c(hdn), c(w2[...]), preferred_element_type=jnp.float32) + b2[...]
    out = x_q + ff                  # dropout_2 -> identity (eval)

    if apply_final_norm:            # fused Encoder.norm (last layer only)
        out = _t_norm_kernel(out, fna[...], fnb[...], approx=approx_recip)

    o_ref[0] = out.astype(o_ref.dtype)


# ------------------------------ wrapper / glue ------------------------------- #

@functools.lru_cache(maxsize=None)
def _buffered_one_supported():
    """Probe whether BlockSpec(pipeline_mode=pl.Buffered(1)) works here."""
    try:
        def _k(x_ref, o_ref):
            o_ref[...] = x_ref[...] + 1.0
        x = jnp.arange(8 * 128, dtype=jnp.float32).reshape(8, 128)
        out = pl.pallas_call(
            _k,
            out_shape=jax.ShapeDtypeStruct((16, 128), jnp.float32),
            grid=(2,),
            in_specs=[pl.BlockSpec((8, 128), lambda i: (0, 0),
                                   pipeline_mode=pl.Buffered(1))],
            out_specs=pl.BlockSpec((8, 128), lambda i: (i, 0)),
        )(x)
        out = np.asarray(jax.block_until_ready(out))
        ref = np.concatenate([np.asarray(x) + 1.0] * 2, axis=0)
        return bool(np.allclose(out, ref))
    except Exception:
        return False


def _const_spec(arr, single_buffer):
    # Constant index_map across the grid; single-buffer when supported.
    nd = arr.ndim
    idx = lambda b, qi, _nd=nd: (0,) * _nd
    if single_buffer:
        return pl.BlockSpec(arr.shape, idx, pipeline_mode=pl.Buffered(1))
    return pl.BlockSpec(arr.shape, idx)


def _default_block_q():
    # v6e/v7x MXU is 256 wide; v5e MXU is 128x128 so 256-row tiles buy nothing.
    try:
        kind = jax.devices()[0].device_kind.lower()
    except Exception:
        kind = ""
    return 128 if "v5" in kind else 256


def _vmem_limit_bytes(S, D, d_ff, bq, weight_buffers, compute_itemsize):
    f32 = 4
    # weights, biases, norm params, PE block (all f32 in HBM)
    w = f32 * (4 * D * D + 2 * D * d_ff + 4 * D + d_ff + D + 6 * D) + f32 * S * D
    w *= weight_buffers
    # x_full + x_q double-buffered in, output tile double-buffered out
    acts = 2 * f32 * (S * D + bq * D) + 2 * f32 * bq * D
    # in-kernel intermediates (norms, q/k/v, per-head scores, FF hidden, scratch)
    tmp = (f32 * (4 * S * D + 6 * bq * D + 2 * bq * S + bq * d_ff)
           + compute_itemsize * (2 * S * D + 2 * bq * D + bq * d_ff + bq * S))
    est = int(1.5 * (w + acts + tmp)) + (8 << 20)      # headroom
    return max(32 << 20, min(est, 64 << 20))            # stay within v7x physical


def encoder_forward(src, params, *, n_heads, block_q=None,
                    compute_dtype=jnp.bfloat16):
    """Forward pass of torch `Encoder` (eval mode, mask=None)."""
    B, S, D = src.shape
    assert D % n_heads == 0
    layers = params["layers"]
    assert len(layers) >= 1, "Encoder with n_layers == 0 not supported"
    pe = params["pe"][:S]                       # (S, D)
    fna, fnb = params["final_norm"]
    d_ff = layers[0][12].shape[1]               # w1: (D, d_ff)

    bq = block_q if block_q is not None else _default_block_q()
    bq = min(bq, S)
    if S % bq != 0 or (bq % 8 != 0 and bq != S):
        bq = S                                   # fall back to one Q tile
    n_qt = S // bq

    single_buffer = _buffered_one_supported()
    compute_dtype = jnp.dtype(compute_dtype)
    approx = bool(compute_dtype == jnp.dtype(jnp.bfloat16))

    cp = pltpu.CompilerParams(
        dimension_semantics=("parallel", "parallel"),
        vmem_limit_bytes=_vmem_limit_bytes(S, D, d_ff, bq,
                                           1 if single_buffer else 2,
                                           compute_dtype.itemsize),
    )

    x_q_spec = pl.BlockSpec((1, bq, D), lambda b, qi: (b, qi, 0))
    x_f_spec = pl.BlockSpec((1, S, D), lambda b, qi: (b, 0, 0))
    pe_q_spec = pl.BlockSpec((bq, D), lambda b, qi: (qi, 0))
    out_spec = pl.BlockSpec((1, bq, D), lambda b, qi: (b, qi, 0))

    x = src
    n_layers = len(layers)
    for li, lp in enumerate(layers):
        is_first = li == 0
        is_last = li == n_layers - 1
        inputs = [x, x]
        specs = [x_q_spec, x_f_spec]
        if is_first:                             # fused positional encoding
            inputs += [pe, pe]
            specs += [pe_q_spec, _const_spec(pe, single_buffer)]
        inputs += list(lp)
        specs += [_const_spec(w, single_buffer) for w in lp]
        if is_last:                              # fused final norm
            inputs += [fna, fnb]
            specs += [_const_spec(fna, single_buffer),
                      _const_spec(fnb, single_buffer)]
        kernel = functools.partial(
            encoder_layer_kernel, heads=n_heads, apply_pe=is_first,
            apply_final_norm=is_last, compute_dtype=compute_dtype,
            approx_recip=approx)
        x = pl.pallas_call(
            kernel,
            out_shape=jax.ShapeDtypeStruct((B, S, D), jnp.float32),
            grid=(B, n_qt),
            in_specs=specs,
            out_specs=out_spec,
            scratch_shapes=[pltpu.VMEM((bq, D), compute_dtype)],
            compiler_params=cp,
        )(*inputs)
    return x


# ----------------------------- parameter setup ------------------------------- #

def _linear_init(key, fan_in, fan_out):
    kw, kb = jax.random.split(key)
    bound = 1.0 / math.sqrt(fan_in)
    w = jax.random.uniform(kw, (fan_in, fan_out), jnp.float32, -bound, bound)
    b = jax.random.uniform(kb, (1, fan_out), jnp.float32, -bound, bound)
    return w, b


def init_params(key, *, d_model, n_layers, d_ff=2048, max_seq_len=512):
    # PositionalEncoder buffer -- exact (non-standard) formula of the torch module.
    pe = np.zeros((max_seq_len, d_model), dtype=np.float32)
    for pos in range(max_seq_len):
        for i in range(0, d_model, 2):
            pe[pos, i] = math.sin(pos / 10000 ** (2 * i / d_model))
            pe[pos, i + 1] = math.cos(pos / 10000 ** (2 * (i + 1) / d_model))
    pe = jnp.asarray(pe)

    layers = []
    for lk in jax.random.split(key, n_layers):
        ks = jax.random.split(lk, 6)
        wq, bq = _linear_init(ks[0], d_model, d_model)
        wk, bk = _linear_init(ks[1], d_model, d_model)
        wv, bv = _linear_init(ks[2], d_model, d_model)
        wo, bo = _linear_init(ks[3], d_model, d_model)
        w1, b1 = _linear_init(ks[4], d_model, d_ff)
        w2, b2 = _linear_init(ks[5], d_ff, d_model)
        n1a = jnp.ones((1, d_model), jnp.float32)
        n1b = jnp.zeros((1, d_model), jnp.float32)
        n2a = jnp.ones((1, d_model), jnp.float32)
        n2b = jnp.zeros((1, d_model), jnp.float32)
        layers.append((n1a, n1b, n2a, n2b, wq, bq, wk, bk, wv, bv,
                       wo, bo, w1, b1, w2, b2))
    final_alpha = jnp.ones((1, d_model), jnp.float32)
    final_bias = jnp.zeros((1, d_model), jnp.float32)
    return {"pe": pe, "layers": layers, "final_norm": (final_alpha, final_bias)}


# ----------------------------- pure-JAX reference ---------------------------- #

def reference_forward(src, params, *, n_heads):
    B, S, D = src.shape
    d_k = D // n_heads
    x = src * math.sqrt(D) + params["pe"][:S][None]
    for lp in params["layers"]:
        (n1a, n1b, n2a, n2b, wq, bq, wk, bk, wv, bv, wo, bo, w1, b1, w2, b2) = lp
        x2 = _t_norm_ref(x, n1a, n1b)
        q = (x2 @ wq + bq).reshape(B, S, n_heads, d_k).transpose(0, 2, 1, 3)
        k = (x2 @ wk + bk).reshape(B, S, n_heads, d_k).transpose(0, 2, 1, 3)
        v = (x2 @ wv + bv).reshape(B, S, n_heads, d_k).transpose(0, 2, 1, 3)
        s = jnp.einsum("bhqd,bhkd->bhqk", q, k) / math.sqrt(d_k)
        p = jax.nn.softmax(s, axis=-1)
        o = jnp.einsum("bhqk,bhkd->bhqd", p, v)
        concat = o.transpose(0, 2, 1, 3).reshape(B, S, D)
        x = x + (concat @ wo + bo)
        x2 = _t_norm_ref(x, n2a, n2b)
        x = x + (jnp.maximum(x2 @ w1 + b1, 0.0) @ w2 + b2)
    alpha, bias = params["final_norm"]
    return _t_norm_ref(x, alpha, bias)


if __name__ == "__main__":
    # Small but TPU-friendly shapes: lane-dense D (multiple of 128), S a multiple
    # of the 8-sublane tile; block_q=8 exercises the (B, S // block_q) grid.
    B, S, D, H, L = 2, 16, 128, 4, 2
    key = jax.random.PRNGKey(0)
    kp, kx = jax.random.split(key)
    params = init_params(kp, d_model=D, n_layers=L, d_ff=256)
    src = jax.random.normal(kx, (B, S, D), jnp.float32)

    ref = reference_forward(src, params, n_heads=H)

    # f32 matmul-operand path: tight fidelity check against torch semantics.
    out_f32 = jax.block_until_ready(
        encoder_forward(src, params, n_heads=H, block_q=8,
                        compute_dtype=jnp.float32))
    np.testing.assert_allclose(np.asarray(out_f32), np.asarray(ref),
                               rtol=2e-3, atol=2e-3)

    # bf16 matmul-operand fast path (f32 accumulation, EUP approx reciprocals):
    # coarse sanity bound; numerical fidelity is carried by the f32 check above.
    out_bf16 = jax.block_until_ready(
        encoder_forward(src, params, n_heads=H, block_q=8,
                        compute_dtype=jnp.bfloat16))
    np.testing.assert_allclose(np.asarray(out_bf16), np.asarray(ref),
                               rtol=1e-1, atol=1e-1)

    print("KERNEL_OK")
</pallas_src>

<mosaic_0001>
module attributes {stable_mosaic.version = 11 : i64} {
  func.func @_k(%arg0: i32, %arg1: memref<8x128xf32, #tpu.memory_space<vmem>>, %arg2: memref<8x128xf32, #tpu.memory_space<vmem>>) attributes {dimension_semantics = [#tpu.dimension_semantics<arbitrary>], iteration_bounds = array<i64: 2>, scalar_prefetch = 0 : i64, scratch_operands = 0 : i64, tpu.core_type = #tpu.core_type<tc>, window_params = [{pipeline_mode = #tpu.pipeline_mode<synchronous>, transform_indices = @transform_0, window_bounds = array<i64: 8, 128>}, {transform_indices = @transform_1, window_bounds = array<i64: 8, 128>}]} {
    %c0 = arith.constant 0 : index
    %c0_0 = arith.constant 0 : index
    %0 = vector.load %arg1[%c0, %c0_0] : memref<8x128xf32, #tpu.memory_space<vmem>>, vector<8x128xf32>
    %cst = arith.constant 1.000000e+00 : f32
    %1 = vector.broadcast %cst : f32 to vector<8x128xf32>
    %2 = arith.addf %0, %1 : vector<8x128xf32>
    %c0_1 = arith.constant 0 : index
    %c0_2 = arith.constant 0 : index
    %3 = vector.load %arg2[%c0_1, %c0_2] : memref<8x128xf32, #tpu.memory_space<vmem>>, vector<8x128xf32>
    tpu.vector_store %arg2[%c0_1, %c0_2], %2 {strides = array<i32>} : memref<8x128xf32, #tpu.memory_space<vmem>>, vector<8x128xf32>,
    return
  }
  func.func @transform_0(%arg0: i32) -> (i32, i32) {
    %c0_i32 = arith.constant 0 : i32
    %c0_i32_0 = arith.constant 0 : i32
    %c0_i32_1 = arith.constant 0 : i32
    return %c0_i32, %c0_i32_0 : i32, i32
  }
  func.func @transform_1(%arg0: i32) -> (i32, i32) {
    %c0_i32 = arith.constant 0 : i32
    %c0_i32_0 = arith.constant 0 : i32
    return %arg0, %c0_i32 : i32, i32
  }
}

module attributes {stable_mosaic.version = 11 : i64} {
  func.func @encoder_layer_kernel(%arg0: i32, %arg1: i32, %arg2: memref<1x8x128xf32, #tpu.memory_space<vmem>>, %arg3: memref<1x16x128xf32, #tpu.memory_space<vmem>>, %arg4: memref<8x128xf32, #tpu.memory_space<vmem>>, %arg5: memref<16x128xf32, #tpu.memory_space<vmem>>, %arg6: memref<1x128xf32, #tpu.memory_space<vmem>>, %arg7: memref<1x128xf32, #tpu.memory_space<vmem>>, %arg8: memref<1x128xf32, #tpu.memory_space<vmem>>, %arg9: memref<1x128xf32, #tpu.memory_space<vmem>>, %arg10: memref<128x128xf32, #tpu.memory_space<vmem>>, %arg11: memref<1x128xf32, #tpu.memory_space<vmem>>, %arg12: memref<128x128xf32, #tpu.memory_space<vmem>>, %arg13: memref<1x128xf32, #tpu.memory_space<vmem>>, %arg14: memref<128x128xf32, #tpu.memory_space<vmem>>, %arg15: memref<1x128xf32, #tpu.memory_space<vmem>>, %arg16: memref<128x128xf32, #tpu.memory_space<vmem>>, %arg17: memref<1x128xf32, #tpu.memory_space<vmem>>, %arg18: memref<128x256xf32, #tpu.memory_space<vmem>>, %arg19: memref<1x256xf32, #tpu.memory_space<vmem>>, %arg20: memref<256x128xf32, #tpu.memory_space<vmem>>, %arg21: memref<1x128xf32, #tpu.memory_space<vmem>>, %arg22: memref<1x8x128xf32, #tpu.memory_space<vmem>>, %arg23: memref<8x128xf32, #tpu.memory_space<vmem>>) attributes {dimension_semantics = [#tpu.dimension_semantics<parallel>, #tpu.dimension_semantics<parallel>], iteration_bounds = array<i64: 2, 2>, scalar_prefetch = 0 : i64, scratch_operands = 1 : i64, tpu.core_type = #tpu.core_type<tc>, window_params = [{transform_indices = @transform_0, window_bounds = array<i64: 1, 8, 128>}, {transform_indices = @transform_1, window_bounds = array<i64: 1, 16, 128>}, {transform_indices = @transform_2, window_bounds = array<i64: 8, 128>}, {pipeline_mode = #tpu.pipeline_mode<synchronous>, transform_indices = @transform_3, window_bounds = array<i64: 16, 128>}, {pipeline_mode = #tpu.pipeline_mode<synchronous>, transform_indices = @transform_4, window_bounds = array<i64: 1, 128>}, {pipeline_mode = #tpu.pipeline_mode<synchronous>, transform_indices = @transform_5, window_bounds = array<i64: 1, 128>}, {pipeline_mode = #tpu.pipeline_mode<synchronous>, transform_indices = @transform_6, window_bounds = array<i64: 1, 128>}, {pipeline_mode = #tpu.pipeline_mode<synchronous>, transform_indices = @transform_7, window_bounds = array<i64: 1, 128>}, {pipeline_mode = #tpu.pipeline_mode<synchronous>, transform_indices = @transform_8, window_bounds = array<i64: 128, 128>}, {pipeline_mode = #tpu.pipeline_mode<synchronous>, transform_indices = @transform_9, window_bounds = array<i64: 1, 128>}, {pipeline_mode = #tpu.pipeline_mode<synchronous>, transform_indices = @transform_10, window_bounds = array<i64: 128, 128>}, {pipeline_mode = #tpu.pipeline_mode<synchronous>, transform_indices = @transform_11, window_bounds = array<i64: 1, 128>}, {pipeline_mode = #tpu.pipeline_mode<synchronous>, transform_indices = @transform_12, window_bounds = array<i64: 128, 128>}, {pipeline_mode = #tpu.pipeline_mode<synchronous>, transform_indices = @transform_13, window_bounds = array<i64: 1, 128>}, {pipeline_mode = #tpu.pipeline_mode<synchronous>, transform_indices = @transform_14, window_bounds = array<i64: 128, 128>}, {pipeline_mode = #tpu.pipeline_mode<synchronous>, transform_indices = @transform_15, window_bounds = array<i64: 1, 128>}, {pipeline_mode = #tpu.pipeline_mode<synchronous>, transform_indices = @transform_16, window_bounds = array<i64: 128, 256>}, {pipeline_mode = #tpu.pipeline_mode<synchronous>, transform_indices = @transform_17, window_bounds = array<i64: 1, 256>}, {pipeline_mode = #tpu.pipeline_mode<synchronous>, transform_indices = @transform_18, window_bounds = array<i64: 256, 128>}, {pipeline_mode = #tpu.pipeline_mode<synchronous>, transform_indices = @transform_19, window_bounds = array<i64: 1, 128>}, {transform_indices = @transform_20, window_bounds = array<i64: 1, 8, 128>}]} {
    %c0 = arith.constant 0 : index
    %c0_0 = arith.constant 0 : index
    %c0_1 = arith.constant 0 : index
    %0 = vector.load %arg2[%c0, %c0_0, %c0_1] : memref<1x8x128xf32, #tpu.memory_space<vmem>>, vector<1x8x128xf32>
    %1 = vector.shape_cast %0 : vector<1x8x128xf32> to vector<8x128xf32>
    %c0_2 = arith.constant 0 : index
    %c0_3 = arith.constant 0 : index
    %c0_4 = arith.constant 0 : index
    %2 = vector.load %arg3[%c0_2, %c0_3, %c0_4] : memref<1x16x128xf32, #tpu.memory_space<vmem>>, vector<1x16x128xf32>
    %3 = vector.shape_cast %2 : vector<1x16x128xf32> to vector<16x128xf32>
    %cst = arith.constant 11.3137083 : f32
    %4 = vector.broadcast %cst : f32 to vector<8x128xf32>
    %5 = arith.mulf %1, %4 : vector<8x128xf32>
    %c0_5 = arith.constant 0 : index
    %c0_6 = arith.constant 0 : index
    %6 = vector.load %arg4[%c0_5, %c0_6] : memref<8x128xf32, #tpu.memory_space<vmem>>, vector<8x128xf32>
    %7 = arith.addf %5, %6 : vector<8x128xf32>
    %cst_7 = arith.constant 11.3137083 : f32
    %8 = vector.broadcast %cst_7 : f32 to vector<16x128xf32>
    %9 = arith.mulf %3, %8 : vector<16x128xf32>
    %c0_8 = arith.constant 0 : index
    %c0_9 = arith.constant 0 : index
    %10 = vector.load %arg5[%c0_8, %c0_9] : memref<16x128xf32, #tpu.memory_space<vmem>>, vector<16x128xf32>
    %11 = arith.addf %9, %10 : vector<16x128xf32>
    %c0_10 = arith.constant 0 : index
    %c0_11 = arith.constant 0 : index
    %12 = vector.load %arg6[%c0_10, %c0_11] : memref<1x128xf32, #tpu.memory_space<vmem>>, vector<1x128xf32>
    %c0_12 = arith.constant 0 : index
    %c0_13 = arith.constant 0 : index
    %13 = vector.load %arg7[%c0_12, %c0_13] : memref<1x128xf32, #tpu.memory_space<vmem>>, vector<1x128xf32>
    %cst_14 = arith.constant dense<0.000000e+00> : vector<8xf32>
    %14 = vector.multi_reduction <add>, %7, %cst_14 [1] : vector<8x128xf32> to vector<8xf32>
    %15 = vector.shape_cast %14 : vector<8xf32> to vector<8x1xf32>
    %cst_15 = arith.constant 1.280000e+02 : f32
    %16 = vector.broadcast %cst_15 : f32 to vector<8x1xf32>
    %17 = arith.divf %15, %16 : vector<8x1xf32>
    %18 = vector.broadcast %17 : vector<8x1xf32> to vector<8x128xf32>
    %19 = arith.subf %7, %18 : vector<8x128xf32>
    %20 = arith.mulf %19, %19 : vector<8x128xf32>
    %cst_16 = arith.constant dense<0.000000e+00> : vector<8xf32>
    %21 = vector.multi_reduction <add>, %20, %cst_16 [1] : vector<8x128xf32> to vector<8xf32>
    %22 = vector.shape_cast %21 : vector<8xf32> to vector<8x1xf32>
    %cst_17 = arith.constant 0.00787401571 : f32
    %23 = vector.broadcast %cst_17 : f32 to vector<8x1xf32>
    %24 = arith.mulf %22, %23 : vector<8x1xf32>
    %25 = math.sqrt %24 : vector<8x1xf32>
    %cst_18 = arith.constant 9.99999997E-7 : f32
    %26 = vector.broadcast %cst_18 : f32 to vector<8x1xf32>
    %27 = arith.addf %25, %26 : vector<8x1xf32>
    %28 = tpu.reciprocal %27 : vector<8x1xf32> -> vector<8x1xf32>
    %29 = vector.broadcast %12 : vector<1x128xf32> to vector<8x128xf32>
    %30 = arith.mulf %29, %19 : vector<8x128xf32>
    %31 = vector.broadcast %28 : vector<8x1xf32> to vector<8x128xf32>
    %32 = arith.mulf %30, %31 : vector<8x128xf32>
    %33 = vector.broadcast %13 : vector<1x128xf32> to vector<8x128xf32>
    %34 = arith.addf %32, %33 : vector<8x128xf32>
    %c0_19 = arith.constant 0 : index
    %c0_20 = arith.constant 0 : index
    %35 = vector.load %arg6[%c0_19, %c0_20] : memref<1x128xf32, #tpu.memory_space<vmem>>, vector<1x128xf32>
    %c0_21 = arith.constant 0 : index
    %c0_22 = arith.constant 0 : index
    %36 = vector.load %arg7[%c0_21, %c0_22] : memref<1x128xf32, #tpu.memory_space<vmem>>, vector<1x128xf32>
    %cst_23 = arith.constant dense<0.000000e+00> : vector<16xf32>
    %37 = vector.multi_reduction <add>, %11, %cst_23 [1] : vector<16x128xf32> to vector<16xf32>
    %38 = vector.shape_cast %37 : vector<16xf32> to vector<16x1xf32>
    %cst_24 = arith.constant 1.280000e+02 : f32
    %39 = vector.broadcast %cst_24 : f32 to vector<16x1xf32>
    %40 = arith.divf %38, %39 : vector<16x1xf32>
    %41 = vector.broadcast %40 : vector<16x1xf32> to vector<16x128xf32>
    %42 = arith.subf %11, %41 : vector<16x128xf32>
    %43 = arith.mulf %42, %42 : vector<16x128xf32>
    %cst_25 = arith.constant dense<0.000000e+00> : vector<16xf32>
    %44 = vector.multi_reduction <add>, %43, %cst_25 [1] : vector<16x128xf32> to vector<16xf32>
    %45 = vector.shape_cast %44 : vector<16xf32> to vector<16x1xf32>
    %cst_26 = arith.constant 0.00787401571 : f32
    %46 = vector.broadcast %cst_26 : f32 to vector<16x1xf32>
    %47 = arith.mulf %45, %46 : vector<16x1xf32>
    %48 = math.sqrt %47 : vector<16x1xf32>
    %cst_27 = arith.constant 9.99999997E-7 : f32
    %49 = vector.broadcast %cst_27 : f32 to vector<16x1xf32>
    %50 = arith.addf %48, %49 : vector<16x1xf32>
    %51 = tpu.reciprocal %50 : vector<16x1xf32> -> vector<16x1xf32>
    %52 = vector.broadcast %35 : vector<1x128xf32> to vector<16x128xf32>
    %53 = arith.mulf %52, %42 : vector<16x128xf32>
    %54 = vector.broadcast %51 : vector<16x1xf32> to vector<16x128xf32>
    %55 = arith.mulf %53, %54 : vector<16x128xf32>
    %56 = vector.broadcast %36 : vector<1x128xf32> to vector<16x128xf32>
    %57 = arith.addf %55, %56 : vector<16x128xf32>
    %c0_28 = arith.constant 0 : index
    %c0_29 = arith.constant 0 : index
    %58 = vector.load %arg10[%c0_28, %c0_29] : memref<128x128xf32, #tpu.memory_space<vmem>>, vector<128x128xf32>
    %cst_30 = arith.constant dense<0.000000e+00> : vector<8x128xf32>
    %59 = tpu.matmul %34, %58, %cst_30 {dimension_numbers = #tpu.dot_dimension_numbers<[1], [0], [0], [1], [0, 0, 1, 1], [], []>} : vector<8x128xf32>, vector<128x128xf32>, vector<8x128xf32> -> vector<8x128xf32>
    %c0_31 = arith.constant 0 : index
    %c0_32 = arith.constant 0 : index
    %60 = vector.load %arg11[%c0_31, %c0_32] : memref<1x128xf32, #tpu.memory_space<vmem>>, vector<1x128xf32>
    %61 = vector.broadcast %60 : vector<1x128xf32> to vector<8x128xf32>
    %62 = arith.addf %59, %61 : vector<8x128xf32>
    %c0_33 = arith.constant 0 : index
    %c0_34 = arith.constant 0 : index
    %63 = vector.load %arg12[%c0_33, %c0_34] : memref<128x128xf32, #tpu.memory_space<vmem>>, vector<128x128xf32>
    %cst_35 = arith.constant dense<0.000000e+00> : vector<16x128xf32>
    %64 = tpu.matmul %57, %63, %cst_35 {dimension_numbers = #tpu.dot_dimension_numbers<[1], [0], [0], [1], [0, 0, 1, 1], [], []>} : vector<16x128xf32>, vector<128x128xf32>, vector<16x128xf32> -> vector<16x128xf32>
    %c0_36 = arith.constant 0 : index
    %c0_37 = arith.constant 0 : index
    %65 = vector.load %arg13[%c0_36, %c0_37] : memref<1x128xf32, #tpu.memory_space<vmem>>, vector<1x128xf32>
    %66 = vector.broadcast %65 : vector<1x128xf32> to vector<16x128xf32>
    %67 = arith.addf %64, %66 : vector<16x128xf32>
    %c0_38 = arith.constant 0 : index
    %c0_39 = arith.constant 0 : index
    %68 = vector.load %arg14[%c0_38, %c0_39] : memref<128x128xf32, #tpu.memory_space<vmem>>, vector<128x128xf32>
    %cst_40 = arith.constant dense<0.000000e+00> : vector<16x128xf32>
    %69 = tpu.matmul %57, %68, %cst_40 {dimension_numbers = #tpu.dot_dimension_numbers<[1], [0], [0], [1], [0, 0, 1, 1], [], []>} : vector<16x128xf32>, vector<128x128xf32>, vector<16x128xf32> -> vector<16x128xf32>
    %c0_41 = arith.constant 0 : index
    %c0_42 = arith.constant 0 : index
    %70 = vector.load %arg15[%c0_41, %c0_42] : memref<1x128xf32, #tpu.memory_space<vmem>>, vector<1x128xf32>
    %71 = vector.broadcast %70 : vector<1x128xf32> to vector<16x128xf32>
    %72 = arith.addf %69, %71 : vector<16x128xf32>
    %73 = vector.extract_strided_slice %62 {offsets = [0, 0], sizes = [8, 32], strides = [1, 1]} : vector<8x128xf32> to vector<8x32xf32>
    %74 = vector.extract_strided_slice %67 {offsets = [0, 0], sizes = [16, 32], strides = [1, 1]} : vector<16x128xf32> to vector<16x32xf32>
    %cst_43 = arith.constant dense<0.000000e+00> : vector<8x16xf32>
    %75 = tpu.matmul %73, %74, %cst_43 {dimension_numbers = #tpu.dot_dimension_numbers<[1], [1], [0], [0], [0, 0, 1, 0], [], []>} : vector<8x32xf32>, vector<16x32xf32>, vector<8x16xf32> -> vector<8x16xf32>
    %cst_44 = arith.constant 0.176776692 : f32
    %76 = vector.broadcast %cst_44 : f32 to vector<8x16xf32>
    %77 = arith.mulf %75, %76 : vector<8x16xf32>
    %cst_45 = arith.constant dense<0xFF800000> : vector<8xf32>
    %78 = vector.multi_reduction <maximumf>, %77, %cst_45 [1] : vector<8x16xf32> to vector<8xf32>
    %79 = vector.shape_cast %78 : vector<8xf32> to vector<8x1xf32>
    %80 = vector.broadcast %79 : vector<8x1xf32> to vector<8x16xf32>
    %81 = arith.subf %77, %80 : vector<8x16xf32>
    %82 = math.exp %81 : vector<8x16xf32>
    %cst_46 = arith.constant dense<0.000000e+00> : vector<8xf32>
    %83 = vector.multi_reduction <add>, %82, %cst_46 [1] : vector<8x16xf32> to vector<8xf32>
    %84 = vector.shape_cast %83 : vector<8xf32> to vector<8x1xf32>
    %85 = tpu.reciprocal %84 : vector<8x1xf32> -> vector<8x1xf32>
    %86 = vector.broadcast %85 : vector<8x1xf32> to vector<8x16xf32>
    %87 = arith.mulf %82, %86 : vector<8x16xf32>
    %88 = vector.extract_strided_slice %72 {offsets = [0, 0], sizes = [16, 32], strides = [1, 1]} : vector<16x128xf32> to vector<16x32xf32>
    %cst_47 = arith.constant dense<0.000000e+00> : vector<8x32xf32>
    %89 = tpu.matmul %87, %88, %cst_47 {dimension_numbers = #tpu.dot_dimension_numbers<[1], [0], [0], [1], [0, 0, 1, 1], [], []>} : vector<8x16xf32>, vector<16x32xf32>, vector<8x32xf32> -> vector<8x32xf32>
    %c0_48 = arith.constant 0 : index
    %c0_49 = arith.constant 0 : index
    %90 = vector.load %arg23[%c0_48, %c0_49] : memref<8x128xf32, #tpu.memory_space<vmem>>, vector<8x32xf32>
    tpu.vector_store %arg23[%c0_48, %c0_49], %89 {strides = array<i32>} : memref<8x128xf32, #tpu.memory_space<vmem>>, vector<8x32xf32>,
    %91 = vector.extract_strided_slice %62 {offsets = [0, 32], sizes = [8, 32], strides = [1, 1]} : vector<8x128xf32> to vector<8x32xf32>
    %92 = vector.extract_strided_slice %67 {offsets = [0, 32], sizes = [16, 32], strides = [1, 1]} : vector<16x128xf32> to vector<16x32xf32>
    %cst_50 = arith.constant dense<0.000000e+00> : vector<8x16xf32>
    %93 = tpu.matmul %91, %92, %cst_50 {dimension_numbers = #tpu.dot_dimension_numbers<[1], [1], [0], [0], [0, 0, 1, 0], [], []>} : vector<8x32xf32>, vector<16x32xf32>, vector<8x16xf32> -> vector<8x16xf32>
    %cst_51 = arith.constant 0.176776692 : f32
    %94 = vector.broadcast %cst_51 : f32 to vector<8x16xf32>
    %95 = arith.mulf %93, %94 : vector<8x16xf32>
    %cst_52 = arith.constant dense<0xFF800000> : vector<8xf32>
    %96 = vector.multi_reduction <maximumf>, %95, %cst_52 [1] : vector<8x16xf32> to vector<8xf32>
    %97 = vector.shape_cast %96 : vector<8xf32> to vector<8x1xf32>
    %98 = vector.broadcast %97 : vector<8x1xf32> to vector<8x16xf32>
    %99 = arith.subf %95, %98 : vector<8x16xf32>
    %100 = math.exp %99 : vector<8x16xf32>
    %cst_53 = arith.constant dense<0.000000e+00> : vector<8xf32>
    %101 = vector.multi_reduction <add>, %100, %cst_53 [1] : vector<8x16xf32> to vector<8xf32>
    %102 = vector.shape_cast %101 : vector<8xf32> to vector<8x1xf32>
    %103 = tpu.reciprocal %102 : vector<8x1xf32> -> vector<8x1xf32>
    %104 = vector.broadcast %103 : vector<8x1xf32> to vector<8x16xf32>
    %105 = arith.mulf %100, %104 : vector<8x16xf32>
    %106 = vector.extract_strided_slice %72 {offsets = [0, 32], sizes = [16, 32], strides = [1, 1]} : vector<16x128xf32> to vector<16x32xf32>
    %cst_54 = arith.constant dense<0.000000e+00> : vector<8x32xf32>
    %107 = tpu.matmul %105, %106, %cst_54 {dimension_numbers = #tpu.dot_dimension_numbers<[1], [0], [0], [1], [0, 0, 1, 1], [], []>} : vector<8x16xf32>, vector<16x32xf32>, vector<8x32xf32> -> vector<8x32xf32>
    %c0_55 = arith.constant 0 : index
    %c32 = arith.constant 32 : index
    %108 = vector.load %arg23[%c0_55, %c32] : memref<8x128xf32, #tpu.memory_space<vmem>>, vector<8x32xf32>
    tpu.vector_store %arg23[%c0_55, %c32], %107 {strides = array<i32>} : memref<8x128xf32, #tpu.memory_space<vmem>>, vector<8x32xf32>,
    %109 = vector.extract_strided_slice %62 {offsets = [0, 64], sizes = [8, 32], strides = [1, 1]} : vector<8x128xf32> to vector<8x32xf32>
    %110 = vector.extract_strided_slice %67 {offsets = [0, 64], sizes = [16, 32], strides = [1, 1]} : vector<16x128xf32> to vector<16x32xf32>
    %cst_56 = arith.constant dense<0.000000e+00> : vector<8x16xf32>
    %111 = tpu.matmul %109, %110, %cst_56 {dimension_numbers = #tpu.dot_dimension_numbers<[1], [1], [0], [0], [0, 0, 1, 0], [], []>} : vector<8x32xf32>, vector<16x32xf32>, vector<8x16xf32> -> vector<8x16xf32>
    %cst_57 = arith.constant 0.176776692 : f32
    %112 = vector.broadcast %cst_57 : f32 to vector<8x16xf32>
    %113 = arith.mulf %111, %112 : vector<8x16xf32>
    %cst_58 = arith.constant dense<0xFF800000> : vector<8xf32>
    %114 = vector.multi_reduction <maximumf>, %113, %cst_58 [1] : vector<8x16xf32> to vector<8xf32>
    %115 = vector.shape_cast %114 : vector<8xf32> to vector<8x1xf32>
    %116 = vector.broadcast %115 : vector<8x1xf32> to vector<8x16xf32>
    %117 = arith.subf %113, %116 : vector<8x16xf32>
    %118 = math.exp %117 : vector<8x16xf32>
    %cst_59 = arith.constant dense<0.000000e+00> : vector<8xf32>
    %119 = vector.multi_reduction <add>, %118, %cst_59 [1] : vector<8x16xf32> to vector<8xf32>
    %120 = vector.shape_cast %119 : vector<8xf32> to vector<8x1xf32>
    %121 = tpu.reciprocal %120 : vector<8x1xf32> -> vector<8x1xf32>
    %122 = vector.broadcast %121 : vector<8x1xf32> to vector<8x16xf32>
    %123 = arith.mulf %118, %122 : vector<8x16xf32>
    %124 = vector.extract_strided_slice %72 {offsets = [0, 64], sizes = [16, 32], strides = [1, 1]} : vector<16x128xf32> to vector<16x32xf32>
    %cst_60 = arith.constant dense<0.000000e+00> : vector<8x32xf32>
    %125 = tpu.matmul %123, %124, %cst_60 {dimension_numbers = #tpu.dot_dimension_numbers<[1], [0], [0], [1], [0, 0, 1, 1], [], []>} : vector<8x16xf32>, vector<16x32xf32>, vector<8x32xf32> -> vector<8x32xf32>
    %c0_61 = arith.constant 0 : index
    %c64 = arith.constant 64 : index
    %126 = vector.load %arg23[%c0_61, %c64] : memref<8x128xf32, #tpu.memory_space<vmem>>, vector<8x32xf32>
    tpu.vector_store %arg23[%c0_61, %c64], %125 {strides = array<i32>} : memref<8x128xf32, #tpu.memory_space<vmem>>, vector<8x32xf32>,
    %127 = vector.extract_strided_slice %62 {offsets = [0, 96], sizes = [8, 32], strides = [1, 1]} : vector<8x128xf32> to vector<8x32xf32>
    %128 = vector.extract_strided_slice %67 {offsets = [0, 96], sizes = [16, 32], strides = [1, 1]} : vector<16x128xf32> to vector<16x32xf32>
    %cst_62 = arith.constant dense<0.000000e+00> : vector<8x16xf32>
    %129 = tpu.matmul %127, %128, %cst_62 {dimension_numbers = #tpu.dot_dimension_numbers<[1], [1], [0], [0], [0, 0, 1, 0], [], []>} : vector<8x32xf32>, vector<16x32xf32>, vector<8x16xf32> -> vector<8x16xf32>
    %cst_63 = arith.constant 0.176776692 : f32
    %130 = vector.broadcast %cst_63 : f32 to vector<8x16xf32>
    %131 = arith.mulf %129, %130 : vector<8x16xf32>
    %cst_64 = arith.constant dense<0xFF800000> : vector<8xf32>
    %132 = vector.multi_reduction <maximumf>, %131, %cst_64 [1] : vector<8x16xf32> to vector<8xf32>
    %133 = vector.shape_cast %132 : vector<8xf32> to vector<8x1xf32>
    %134 = vector.broadcast %133 : vector<8x1xf32> to vector<8x16xf32>
    %135 = arith.subf %131, %134 : vector<8x16xf32>
    %136 = math.exp %135 : vector<8x16xf32>
    %cst_65 = arith.constant dense<0.000000e+00> : vector<8xf32>
    %137 = vector.multi_reduction <add>, %136, %cst_65 [1] : vector<8x16xf32> to vector<8xf32>
    %138 = vector.shape_cast %137 : vector<8xf32> to vector<8x1xf32>
    %139 = tpu.reciprocal %138 : vector<8x1xf32> -> vector<8x1xf32>
    %140 = vector.broadcast %139 : vector<8x1xf32> to vector<8x16xf32>
    %141 = arith.mulf %136, %140 : vector<8x16xf32>
    %142 = vector.extract_strided_slice %72 {offsets = [0, 96], sizes = [16, 32], strides = [1, 1]} : vector<16x128xf32> to vector<16x32xf32>
    %cst_66 = arith.constant dense<0.000000e+00> : vector<8x32xf32>
    %143 = tpu.matmul %141, %142, %cst_66 {dimension_numbers = #tpu.dot_dimension_numbers<[1], [0], [0], [1], [0, 0, 1, 1], [], []>} : vector<8x16xf32>, vector<16x32xf32>, vector<8x32xf32> -> vector<8x32xf32>
    %c0_67 = arith.constant 0 : index
    %c96 = arith.constant 96 : index
    %144 = vector.load %arg23[%c0_67, %c96] : memref<8x128xf32, #tpu.memory_space<vmem>>, vector<8x32xf32>
    tpu.vector_store %arg23[%c0_67, %c96], %143 {strides = array<i32>} : memref<8x128xf32, #tpu.memory_space<vmem>>, vector<8x32xf32>,
    %c0_68 = arith.constant 0 : index
    %c0_69 = arith.constant 0 : index
    %145 = vector.load %arg23[%c0_68, %c0_69] : memref<8x128xf32, #tpu.memory_space<vmem>>, vector<8x128xf32>
    %c0_70 = arith.constant 0 : index
    %c0_71 = arith.constant 0 : index
    %146 = vector.load %arg16[%c0_70, %c0_71] : memref<128x128xf32, #tpu.memory_space<vmem>>, vector<128x128xf32>
    %cst_72 = arith.constant dense<0.000000e+00> : vector<8x128xf32>
    %147 = tpu.matmul %145, %146, %cst_72 {dimension_numbers = #tpu.dot_dimension_numbers<[1], [0], [0], [1], [0, 0, 1, 1], [], []>} : vector<8x128xf32>, vector<128x128xf32>, vector<8x128xf32> -> vector<8x128xf32>
    %c0_73 = arith.constant 0 : index
    %c0_74 = arith.constant 0 : index
    %148 = vector.load %arg17[%c0_73, %c0_74] : memref<1x128xf32, #tpu.memory_space<vmem>>, vector<1x128xf32>
    %149 = vector.broadcast %148 : vector<1x128xf32> to vector<8x128xf32>
    %150 = arith.addf %147, %149 : vector<8x128xf32>
    %151 = arith.addf %7, %150 : vector<8x128xf32>
    %c0_75 = arith.constant 0 : index
    %c0_76 = arith.constant 0 : index
    %152 = vector.load %arg8[%c0_75, %c0_76] : memref<1x128xf32, #tpu.memory_space<vmem>>, vector<1x128xf32>
    %c0_77 = arith.constant 0 : index
    %c0_78 = arith.constant 0 : index
    %153 = vector.load %arg9[%c0_77, %c0_78] : memref<1x128xf32, #tpu.memory_space<vmem>>, vector<1x128xf32>
    %cst_79 = arith.constant dense<0.000000e+00> : vector<8xf32>
    %154 = vector.multi_reduction <add>, %151, %cst_79 [1] : vector<8x128xf32> to vector<8xf32>
    %155 = vector.shape_cast %154 : vector<8xf32> to vector<8x1xf32>
    %cst_80 = arith.constant 1.280000e+02 : f32
    %156 = vector.broadcast %cst_80 : f32 to vector<8x1xf32>
    %157 = arith.divf %155, %156 : vector<8x1xf32>
    %158 = vector.broadcast %157 : vector<8x1xf32> to vector<8x128xf32>
    %159 = arith.subf %151, %158 : vector<8x128xf32>
    %160 = arith.mulf %159, %159 : vector<8x128xf32>
    %cst_81 = arith.constant dense<0.000000e+00> : vector<8xf32>
    %161 = vector.multi_reduction <add>, %160, %cst_81 [1] : vector<8x128xf32> to vector<8xf32>
    %162 = vector.shape_cast %161 : vector<8xf32> to vector<8x1xf32>
    %cst_82 = arith.constant 0.00787401571 : f32
    %163 = vector.broadcast %cst_82 : f32 to vector<8x1xf32>
    %164 = arith.mulf %162, %163 : vector<8x1xf32>
    %165 = math.sqrt %164 : vector<8x1xf32>
    %cst_83 = arith.constant 9.99999997E-7 : f32
    %166 = vector.broadcast %cst_83 : f32 to vector<8x1xf32>
    %167 = arith.addf %165, %166 : vector<8x1xf32>
    %168 = tpu.reciprocal %167 : vector<8x1xf32> -> vector<8x1xf32>
    %169 = vector.broadcast %152 : vector<1x128xf32> to vector<8x128xf32>
    %170 = arith.mulf %169, %159 : vector<8x128xf32>
    %171 = vector.broadcast %168 : vector<8x1xf32> to vector<8x128xf32>
    %172 = arith.mulf %170, %171 : vector<8x128xf32>
    %173 = vector.broadcast %153 : vector<1x128xf32> to vector<8x128xf32>
    %174 = arith.addf %172, %173 : vector<8x128xf32>
    %c0_84 = arith.constant 0 : index
    %c0_85 = arith.constant 0 : index
    %175 = vector.load %arg18[%c0_84, %c0_85] : memref<128x256xf32, #tpu.memory_space<vmem>>, vector<128x256xf32>
    %cst_86 = arith.constant dense<0.000000e+00> : vector<8x256xf32>
    %176 = tpu.matmul %174, %175, %cst_86 {dimension_numbers = #tpu.dot_dimension_numbers<[1], [0], [0], [1], [0, 0, 1, 1], [], []>} : vector<8x128xf32>, vector<128x256xf32>, vector<8x256xf32> -> vector<8x256xf32>
    %c0_87 = arith.constant 0 : index
    %c0_88 = arith.constant 0 : index
    %177 = vector.load %arg19[%c0_87, %c0_88] : memref<1x256xf32, #tpu.memory_space<vmem>>, vector<1x256xf32>
    %178 = vector.broadcast %177 : vector<1x256xf32> to vector<8x256xf32>
    %179 = arith.addf %176, %178 : vector<8x256xf32>
    %cst_89 = arith.constant 0.000000e+00 : f32
    %180 = vector.broadcast %cst_89 : f32 to vector<8x256xf32>
    %181 = arith.maximumf %179, %180 : vector<8x256xf32>
    %c0_90 = arith.constant 0 : index
    %c0_91 = arith.constant 0 : index
    %182 = vector.load %arg20[%c0_90, %c0_91] : memref<256x128xf32, #tpu.memory_space<vmem>>, vector<256x128xf32>
    %cst_92 = arith.constant dense<0.000000e+00> : vector<8x128xf32>
    %183 = tpu.matmul %181, %182, %cst_92 {dimension_numbers = #tpu.dot_dimension_numbers<[1], [0], [0], [1], [0, 0, 1, 1], [], []>} : vector<8x256xf32>, vector<256x128xf32>, vector<8x128xf32> -> vector<8x128xf32>
    %c0_93 = arith.constant 0 : index
    %c0_94 = arith.constant 0 : index
    %184 = vector.load %arg21[%c0_93, %c0_94] : memref<1x128xf32, #tpu.memory_space<vmem>>, vector<1x128xf32>
    %185 = vector.broadcast %184 : vector<1x128xf32> to vector<8x128xf32>
    %186 = arith.addf %183, %185 : vector<8x128xf32>
    %187 = arith.addf %151, %186 : vector<8x128xf32>
    %c0_95 = arith.constant 0 : index
    %c0_96 = arith.constant 0 : index
    %c0_97 = arith.constant 0 : index
    %188 = vector.load %arg22[%c0_95, %c0_96, %c0_97] : memref<1x8x128xf32, #tpu.memory_space<vmem>>, vector<1x8x128xf32>
    %189 = vector.shape_cast %188 : vector<1x8x128xf32> to vector<8x128xf32>
    %190 = vector.shape_cast %187 : vector<8x128xf32> to vector<1x8x128xf32>
    tpu.vector_store %arg22[%c0_95, %c0_96, %c0_97], %190 {strides = array<i32>} : memref<1x8x128xf32, #tpu.memory_space<vmem>>, vector<1x8x128xf32>,
    return
  }
  func.func @transform_0(%arg0: i32, %arg1: i32) -> (i32, i32, i32) {
    %c0_i32 = arith.constant 0 : i32
    %c0_i32_0 = arith.constant 0 : i32
    return %arg0, %arg1, %c0_i32 : i32, i32, i32
  }
  func.func @transform_1(%arg0: i32, %arg1: i32) -> (i32, i32, i32) {
    %c0_i32 = arith.constant 0 : i32
    %c0_i32_0 = arith.constant 0 : i32
    %c0_i32_1 = arith.constant 0 : i32
    return %arg0, %c0_i32, %c0_i32_0 : i32, i32, i32
  }
  func.func @transform_2(%arg0: i32, %arg1: i32) -> (i32, i32) {
    %c0_i32 = arith.constant 0 : i32
    %c0_i32_0 = arith.constant 0 : i32
    return %arg1, %c0_i32 : i32, i32
  }
  func.func @transform_3(%arg0: i32, %arg1: i32) -> (i32, i32) {
    %c0_i32 = arith.constant 0 : i32
    %c0_i32_0 = arith.constant 0 : i32
    %c0_i32_1 = arith.constant 0 : i32
    return %c0_i32, %c0_i32_0 : i32, i32
  }
  func.func @transform_4(%arg0: i32, %arg1: i32) -> (i32, i32) {
    %c0_i32 = arith.constant 0 : i32
    %c0_i32_0 = arith.constant 0 : i32
    %c0_i32_1 = arith.constant 0 : i32
    return %c0_i32, %c0_i32_0 : i32, i32
  }
  func.func @transform_5(%arg0: i32, %arg1: i32) -> (i32, i32) {
    %c0_i32 = arith.constant 0 : i32
    %c0_i32_0 = arith.constant 0 : i32
    %c0_i32_1 = arith.constant 0 : i32
    return %c0_i32, %c0_i32_0 : i32, i32
  }
  func.func @transform_6(%arg0: i32, %arg1: i32) -> (i32, i32) {
    %c0_i32 = arith.constant 0 : i32
    %c0_i32_0 = arith.constant 0 : i32
    %c0_i32_1 = arith.constant 0 : i32
    return %c0_i32, %c0_i32_0 : i32, i32
  }
  func.func @transform_7(%arg0: i32, %arg1: i32) -> (i32, i32) {
    %c0_i32 = arith.constant 0 : i32
    %c0_i32_0 = arith.constant 0 : i32
    %c0_i32_1 = arith.constant 0 : i32
    return %c0_i32, %c0_i32_0 : i32, i32
  }
  func.func @transform_8(%arg0: i32, %arg1: i32) -> (i32, i32) {
    %c0_i32 = arith.constant 0 : i32
    %c0_i32_0 = arith.constant 0 : i32
    %c0_i32_1 = arith.constant 0 : i32
    return %c0_i32, %c0_i32_0 : i32, i32
  }
  func.func @transform_9(%arg0: i32, %arg1: i32) -> (i32, i32) {
    %c0_i32 = arith.constant 0 : i32
    %c0_i32_0 = arith.constant 0 : i32
    %c0_i32_1 = arith.constant 0 : i32
    return %c0_i32, %c0_i32_0 : i32, i32
  }
  func.func @transform_10(%arg0: i32, %arg1: i32) -> (i32, i32) {
    %c0_i32 = arith.constant 0 : i32
    %c0_i32_0 = arith.constant 0 : i32
    %c0_i32_1 = arith.constant 0 : i32
    return %c0_i32, %c0_i32_0 : i32, i32
  }
  func.func @transform_11(%arg0: i32, %arg1: i32) -> (i32, i32) {
    %c0_i32 = arith.constant 0 : i32
    %c0_i32_0 = arith.constant 0 : i32
    %c0_i32_1 = arith.constant 0 : i32
    return %c0_i32, %c0_i32_0 : i32, i32
  }
  func.func @transform_12(%arg0: i32, %arg1: i32) -> (i32, i32) {
    %c0_i32 = arith.constant 0 : i32
    %c0_i32_0 = arith.constant 0 : i32
    %c0_i32_1 = arith.constant 0 : i32
    return %c0_i32, %c0_i32_0 : i32, i32
  }
  func.func @transform_13(%arg0: i32, %arg1: i32) -> (i32, i32) {
    %c0_i32 = arith.constant 0 : i32
    %c0_i32_0 = arith.constant 0 : i32
    %c0_i32_1 = arith.constant 0 : i32
    return %c0_i32, %c0_i32_0 : i32, i32
  }
  func.func @transform_14(%arg0: i32, %arg1: i32) -> (i32, i32) {
    %c0_i32 = arith.constant 0 : i32
    %c0_i32_0 = arith.constant 0 : i32
    %c0_i32_1 = arith.constant 0 : i32
    return %c0_i32, %c0_i32_0 : i32, i32
  }
  func.func @transform_15(%arg0: i32, %arg1: i32) -> (i32, i32) {
    %c0_i32 = arith.constant 0 : i32
    %c0_i32_0 = arith.constant 0 : i32
    %c0_i32_1 = arith.constant 0 : i32
    return %c0_i32, %c0_i32_0 : i32, i32
  }
  func.func @transform_16(%arg0: i32, %arg1: i32) -> (i32, i32) {
    %c0_i32 = arith.constant 0 : i32
    %c0_i32_0 = arith.constant 0 : i32
    %c0_i32_1 = arith.constant 0 : i32
    return %c0_i32, %c0_i32_0 : i32, i32
  }
  func.func @transform_17(%arg0: i32, %arg1: i32) -> (i32, i32) {
    %c0_i32 = arith.constant 0 : i32
    %c0_i32_0 = arith.constant 0 : i32
    %c0_i32_1 = arith.constant 0 : i32
    return %c0_i32, %c0_i32_0 : i32, i32
  }
  func.func @transform_18(%arg0: i32, %arg1: i32) -> (i32, i32) {
    %c0_i32 = arith.constant 0 : i32
    %c0_i32_0 = arith.constant 0 : i32
    %c0_i32_1 = arith.constant 0 : i32
    return %c0_i32, %c0_i32_0 : i32, i32
  }
  func.func @transform_19(%arg0: i32, %arg1: i32) -> (i32, i32) {
    %c0_i32 = arith.constant 0 : i32
    %c0_i32_0 = arith.constant 0 : i32
    %c0_i32_1 = arith.constant 0 : i32
    return %c0_i32, %c0_i32_0 : i32, i32
  }
  func.func @transform_20(%arg0: i32, %arg1: i32) -> (i32, i32, i32) {
    %c0_i32 = arith.constant 0 : i32
    %c0_i32_0 = arith.constant 0 : i32
    return %arg0, %arg1, %c0_i32 : i32, i32, i32
  }
}

</mosaic_0001>

<bundles_post_ra>
// kernel: tpu_custom_call.1
= control target key start
LH: loop header
LB: loop body
LE: loop exit
PB: predicated region body
PF: predicated region fallthrough
CT: control target
= control target key end

     0   :  { %6 = vsyncpa [#allocation3], 0  ;;  %s482_s0 = inlined_call_operand.hbm [shape: f32[8,128], index: 0, kind: input, shape index: {}]   ;;  %s483_s1 = inlined_call_operand.hbm [shape: f32[16,128], index: 1, kind: output, shape index: {}]  }
   0x1   :  { %7 = vsyncpa [#allocation4], 0 }
   0x2   :  { %9 = vsyncpa [#allocation4 + $0x1], 0  ;;  %s352_s6 = smov 0   ;;  %s354_s7 = smov 0  }
   0x3   :  { %s356_s8 = smov 0   ;;  %s358_s9 = smov 0  }
   0x4 LB: > { %s373_s10 = sadd.s32 4294967295, %s338_s9   ;;  %s184_s11 = sadd.s32 4294967294, %s338_s9   ;;  %s338_s9 = sphi %s358_s9, %s499_s9   ;;  %s334_s8 = sphi %s356_s8, %s498_s8   ;;  %s330_s7 = sphi %s354_s7, %s497_s7   ;;  %s326_s6 = sphi %s352_s6, %s496_s6  }
   0x5   : > { %s377_s12 = sadd.s32 1, %s338_s9   ;;  %s43_s13 = sadd.s32 1, %s334_s8 }
   0x6   : > { %s40_s14 = ssub.s32 %s338_s9, %s377_s12  ;;  %p53_p0 = scmp.ne.s32.totalorder %s334_s8, %s330_s7 }
   0x7   : > { %p41_p1 = scmp.eq.s32.totalorder %s40_s14, 0  ;;  %p54_p2 = scmp.eq.s32.totalorder %s373_s10, 1 }
   0x8   : > { %p59_p3 = scmp.ne.s32.totalorder %s330_s7, %s326_s6  ;;  %p60_p4 = scmp.eq.s32.totalorder %s184_s11, 1 }
   0x9   : > { %s388_s15 = scalar_select %p41_p1, %s334_s8, %s43_s13  }
   0xa   : > { %p390_p5 = por %p54_p2, %p53_p0  ;;  %p394_p6 = por %p60_p4, %p59_p3 }
   0xb   : > { %p185_p7 = scmp.ge.s32.totalorder %s338_s9, 1  ;;  %p67_p8 = scmp.lt.s32.totalorder %s338_s9, 3 }
   0xc   : > { %s487_s16 = scalar_select %p390_p5, 1, 0 }
   0xd   : > { %s488_s17 = scalar_select %p394_p6, 1, 0 }
   0xe   : > { %p484_p9 = scmp.eq.s32.totalorder %s373_s10, 0  ;;  %p401_p10 = pnand %p185_p7, %p67_p8 }
   0xf   : > { %s340_s19 = smov [#allocation2]   ;;  %s244_s24 = scalar_lea.hbm %s482_s0, 128 }
  0x10   : > { %s489_s18 = scalar_select %p401_p10, 1, 0 }
  0x11   : > { %s80_s20 = sshll.u32 %s340_s19, 4  ;;  %p200_p11 = pneg %p401_p10  ;;  %s81_s20 = int_to_ptr.vmem [resolvable:$true] %s80_s20 }
  0x12   : > { %p245_p13 = scmp.ne.s32.totalorder %s482_s0, %s244_s24  ;;  %p251_p3 = scmp.lt.u32.totalorder %s244_s24, %s482_s0 }
  0x13   : > { %p409_p12 = pnand %p484_p9, %p200_p11 }
  0x15   : > { %p246_p0 = pneg %p409_p12 }
  0x17   : > { %p247_p1 = pnand %p246_p0, %p245_p13 }
  0x19   : > { %p248_p2 = pneg %p247_p1 }
  0x1b   : > { %p253_p4 = pnand %p251_p3, %p248_p2 }
  0x1d   : > { %256 = shalt.err (!%p253_p4)
}
  0x1e   : > { %s257_s29 = scalar_lea.vmem %s81_s20, 128  ;;  %p265_p9 = scmp.lt.s32.totalorder %s81_s20, %s81_s20 }
  0x1f   : > { %p258_p7 = scmp.ne.s32.totalorder %s81_s20, %s257_s29  ;;  %p266_p6 = scmp.lt.s32.totalorder %s257_s29, %s257_s29 }
  0x21   : > { %p260_p8 = pnand %p258_p7, %p246_p0  ;;  %p267_p5 = por %p266_p6, %p265_p9 }
  0x23   : > { %p261_p11 = pneg %p260_p8 }
  0x25   : > { %p268_p10 = pnand %p267_p5, %p261_p11 }
  0x27   : > { %271 = shalt.err (!%p268_p10)
}
  0x28   : > { %203 = dma.hbm_to_vmem [thread:$0]  (!%p409_p12), %s482_s0, 128, %s81_s20, [#allocation3]  }
  0x29   : > { %p491_p13 = scmp.ne.s32.totalorder %s489_s18, 0 }
  0x2a   : > { %p492_p1 = scmp.eq.s32.totalorder (!%p491_p13), %s373_s10, 0 }
  0x2b   : > { %93 = sbr.rel (%p491_p13) target bundleno = 77 (0x4d), region = 24 }
  0x32   : > { %317 = dma.done.wait (%p492_p1), [#allocation3], 128   ;;  %p493_p0 = pmov %p492_p1 }
  0x33   : > { %s105_s3 = sand.u32 1, %s330_s7   ;;  %s191_s13 = sshll.u32 %s373_s10, 7  ;;  %v108_v0 = vld [vmem:[#allocation2] sm:$0xff] }
  0x34   : > { %319 = vsyncadd (%p493_p0), [#allocation3], 4294967168  ;;  %s189_s4 = sshll.u32 %s105_s3, 3  ;;  %v109_v1 = vadd.f32 1.0, %v108_v0  ;;  %s442_s19 = scalar_lea.hbm %s483_s1, %s191_s13 }
  0x35   : > { %s107_s5 = scalar_lea.vmem [#allocation5], %s189_s4  ;;  %s112_s20 = scalar_lea.sflag [#allocation4], %s105_s3 }
  0x36   : > { %s125_s11 = sshll.u32 %s107_s5, 4  ;;  %110 = vst [vmem:[%s107_s5] sm:$0xff] %v109_v1  ;;  %p494_p6 = scmp.ne.s32.totalorder %s487_s16, 0  ;;  %s437_s11 = int_to_ptr.vmem [resolvable:$true] %s125_s11 }
  0x37   : > { %s272_s21 = scalar_lea.vmem %s437_s11, 128  ;;  %s341_s10 = smov [#allocation5]  }
  0x38   : > { %p273_p5 = scmp.ne.s32.totalorder %s437_s11, %s272_s21  ;;  %s276_s22 = sshll.u32 %s341_s10, 4  ;;  %s277_s22 = int_to_ptr.vmem [resolvable:$false] %s276_s22 }
  0x39   : > { %s278_s23 = scalar_lea.vmem %s277_s22, 256  ;;  %p279_p12 = scmp.lt.s32.totalorder %s437_s11, %s277_s22 }
  0x3a   : > { %p274_p9 = pnand %p273_p5, %p494_p6  ;;  %p280_p2 = scmp.lt.s32.totalorder %s278_s23, %s272_s21 }
  0x3c   : > { %p275_p10 = pneg %p274_p9  ;;  %p281_p3 = por %p280_p2, %p279_p12 }
  0x3e   : > { %p282_p4 = pnand %p281_p3, %p275_p10 }
  0x40   : > { %285 = shalt.err (!%p282_p4)
}
  0x41   : > { %s286_s24 = scalar_lea.hbm %s442_s19, 128  ;;  %s290_s27 = scalar_lea.hbm %s483_s1, 256 }
  0x42   : > { %p287_p7 = scmp.ne.s32.totalorder %s442_s19, %s286_s24  ;;  %p291_p13 = scmp.lt.u32.totalorder %s442_s19, %s483_s1 }
  0x43   : > { %p292_p1 = scmp.lt.u32.totalorder %s290_s27, %s286_s24  ;;  %p294_p5 = scmp.lt.u32.totalorder %s286_s24, %s442_s19 }
  0x44   : > { %p288_p8 = pnand %p287_p7, %p494_p6 }
  0x45   : > { %p293_p0 = por %p292_p1, %p291_p13 }
  0x46   : > { %p289_p11 = pneg %p288_p8 }
  0x47   : > { %p295_p9 = por %p294_p5, %p293_p0 }
  0x49   : > { %p296_p10 = pnand %p295_p9, %p289_p11 }
  0x4b   : > { %299 = shalt.err (!%p296_p10)
}
  0x4c   : > { %198 = dma.vmem_to_hbm [thread:$0]  (%p494_p6), %s437_s11, 128, %s442_s19, %s112_s20  }
  0x4d PF: > { %p210_p12 = scmp.ge.s32.totalorder %s338_s9, 2  ;;  %s137_s30 = sand.u32 1, %s326_s6  }
  0x4e   : > { %p495_p2 = scmp.ne.s32.totalorder %s488_s17, 0  ;;  %s138_s2 = scalar_lea.sflag [#allocation4], %s137_s30 }
  0x50   : > { %p205_p3 = pnand %p210_p12, %p495_p2 }
  0x52   : > { %321 = dma.done.wait (!%p205_p3), %s138_s2, 128  }
  0x53   : > { %323 = vsyncadd (!%p205_p3), %s138_s2, 4294967168  ;;  %p12_p4 = scmp.ge.s32.totalorder %s377_s12, 4   ;;  %s496_s6 = smov %s330_s7 }
  0x54   : > { %s497_s7 = smov %s334_s8  ;;  %s498_s8 = smov %s388_s15 }
  0x55   : > { %s499_s9 = smov %s377_s12  ;;  %14 = sbr.rel (!%p12_p4) target bundleno = 4 (0x4), region = 61 }
  0x5c   :  { %143 = vsyncpa [#allocation3], 1 }
  0x5d   :  { %145 = vsyncpa [#allocation3 + $0x1], 1 }
  0x5e   :  { %146 = vsyncpa [#allocation4], 1 }
  0x5f   :  { %148 = vsyncpa [#allocation4 + $0x1], 1 }

// kernel: tpu_custom_call.1
= control target key start
LH: loop header
LB: loop body
LE: loop exit
PB: predicated region body
PF: predicated region fallthrough
CT: control target
= control target key end

     0   :  { %s4705_s0 = inlined_call_operand.hbm [shape: f32[2,16,128], index: 0, kind: input, shape index: {}]   ;;  %s4706_s1 = inlined_call_operand.hbm [shape: f32[2,16,128], index: 1, kind: input, shape index: {}]   ;;  %s4707_s2 = inlined_call_operand.hbm [shape: f32[16,128], index: 2, kind: input, shape index: {}]   ;;  %s4708_s3 = inlined_call_operand.hbm [shape: f32[16,128], index: 3, kind: input, shape index: {}]   ;;  %s4709_s4 = inlined_call_operand.vmem [shape: f32[1,128], index: 4, kind: input, shape index: {}]   ;;  %s4710_s5 = inlined_call_operand.vmem [shape: f32[1,128], index: 5, kind: input, shape index: {}]   ;;  %s4711_s6 = inlined_call_operand.vmem [shape: f32[1,128], index: 6, kind: input, shape index: {}]   ;;  %s4712_s7 = inlined_call_operand.vmem [shape: f32[1,128], index: 7, kind: input, shape index: {}]   ;;  %s4713_s8 = inlined_call_operand.hbm [shape: f32[128,128], index: 8, kind: input, shape index: {}]   ;;  %s4714_s9 = inlined_call_operand.vmem [shape: f32[1,128], index: 9, kind: input, shape index: {}]   ;;  %s4715_s10 = inlined_call_operand.hbm [shape: f32[128,128], index: 10, kind: input, shape index: {}]   ;;  %s4716_s11 = inlined_call_operand.vmem [shape: f32[1,128], index: 11, kind: input, shape index: {}]   ;;  %s4717_s12 = inlined_call_operand.hbm [shape: f32[128,128], index: 12, kind: input, shape index: {}]   ;;  %s4718_s13 = inlined_call_operand.vmem [shape: f32[1,128], index: 13, kind: input, shape index: {}]   ;;  %s4719_s14 = inlined_call_operand.hbm [shape: f32[128,128], index: 14, kind: input, shape index: {}]   ;;  %s4720_s15 = inlined_call_operand.vmem [shape: f32[1,128], index: 15, kind: input, shape index: {}]   ;;  %s4721_s16 = inlined_call_operand.hbm [shape: f32[128,256], index: 16, kind: input, shape index: {}]   ;;  %s4722_s17 = inlined_call_operand.vmem [shape: f32[1,256], index: 17, kind: input, shape index: {}]   ;;  %s4723_s18 = inlined_call_operand.hbm [shape: f32[256,128], index: 18, kind: input, shape index: {}]   ;;  %s4724_s19 = inlined_call_operand.vmem [shape: f32[1,128], index: 19, kind: input, shape index: {}]   ;;  %s4725_s20 = inlined_call_operand.hbm [shape: f32[2,16,128], index: 20, kind: output, shape index: {}]  }
   0x1   :  { %4754 = sst [smem:[#allocation38_spill]] %s4705_s0 }
   0x2   :  { %4755 = sst [smem:[#allocation39_spill]] %s4706_s1 }
   0x3   :  { %4756 = sst [smem:[#allocation40_spill]] %s4707_s2 }
   0x4   :  { %4757 = sst [smem:[#allocation41_spill]] %s4708_s3 }
   0x5   :  { %4758 = sst [smem:[#allocation42_spill]] %s4709_s4 }
   0x6   :  { %4759 = sst [smem:[#allocation43_spill]] %s4710_s5 }
   0x7   :  { %4760 = sst [smem:[#allocation44_spill]] %s4711_s6 }
   0x8   :  { %4761 = sst [smem:[#allocation45_spill]] %s4712_s7 }
   0x9   :  { %4762 = sst [smem:[#allocation46_spill]] %s4713_s8 }
   0xa   :  { %4763 = sst [smem:[#allocation47_spill]] %s4714_s9 }
   0xb   :  { %4764 = sst [smem:[#allocation48_spill]] %s4715_s10 }
   0xc   :  { %4765 = sst [smem:[#allocation49_spill]] %s4716_s11 }
   0xd   :  { %4766 = sst [smem:[#allocation50_spill]] %s4717_s12 }
   0xe   :  { %4767 = sst [smem:[#allocation51_spill]] %s4718_s13 }
   0xf   :  { %4768 = sst [smem:[#allocation52_spill]] %s4719_s14 }
  0x10   :  { %4769 = sst [smem:[#allocation53_spill]] %s4720_s15 }
  0x11   :  { %4770 = sst [smem:[#allocation54_spill]] %s4721_s16 }
  0x12   :  { %4771 = sst [smem:[#allocation55_spill]] %s4722_s17 }
  0x13   :  { %4772 = sst [smem:[#allocation56_spill]] %s4723_s18 }
  0x14   :  { %4773 = sst [smem:[#allocation57_spill]] %s4724_s19 }
  0x15   :  { %4774 = sst [smem:[#allocation58_spill]] %s4725_s20 }
  0x16   :  { %25 = vsyncpa [#allocation4], 0 }
  0x17   :  { %27 = vsyncpa [#allocation4 + $0x1], 0 }
  0x18   :  { %28 = vsyncpa [#allocation7], 0 }
  0x19   :  { %30 = vsyncpa [#allocation7 + $0x1], 0 }
  0x1a   :  { %31 = vsyncpa [#allocation10], 0 }
  0x1b   :  { %32 = vsyncpa [#allocation13], 0 }
  0x1c   :  { %33 = vsyncpa [#allocation16], 0 }
  0x1d   :  { %34 = vsyncpa [#allocation19], 0 }
  0x1e   :  { %35 = vsyncpa [#allocation5], 0 }
  0x1f   :  { %37 = vsyncpa [#allocation5 + $0x1], 0  ;;  %s3943_s1 = smov 0   ;;  %s3945_s22 = smov 0  }
  0x20   :  { %s3947_s23 = smov 0   ;;  %s3949_s24 = smov 0  }
  0x21   :  { %s3951_s2 = smov 0   ;;  %s3953_s25 = smov 0  }
  0x22   :  { %s3955_s3 = smov 0   ;;  %s3957_s26 = smov 0  }
  0x23   :  { %s3959_s27 = smov 0   ;;  %s3961_s28 = smov 0  }
  0x24   :  { %s3963_s4 = smov 0   ;;  %s3965_s29 = smov 0  }
  0x25   :  { %s3967_s30 = smov 0   ;;  %s3969_s0 = smov 0  }
  0x26 LB: > { %4775 = sst [smem:[#allocation29_spill]] %s3763_s1  ;;  %s4014_s21 = sadd.s32 4294967295, %s3815_s0   ;;  %s3815_s0 = sphi %s3969_s0, %s43_s0   ;;  %s3811_s30 = sphi %s3967_s30, %s4871_s30   ;;  %s3807_s29 = sphi %s3965_s29, %s4870_s29   ;;  %s3803_s4 = sphi %s3963_s4, %s4869_s4   ;;  %s3799_s28 = sphi %s3961_s28, %s4868_s28   ;;  %s3795_s27 = sphi %s3959_s27, %s4867_s27   ;;  %s3791_s26 = sphi %s3957_s26, %s4866_s26   ;;  %s3787_s3 = sphi %s3955_s3, %s4860_s3   ;;  %s3783_s25 = sphi %s3953_s25, %s4865_s25   ;;  %s3779_s2 = sphi %s3951_s2, %s4864_s2   ;;  %s3775_s24 = sphi %s3949_s24, %s4863_s24   ;;  %s3771_s23 = sphi %s3947_s23, %s4862_s23   ;;  %s3767_s22 = sphi %s3945_s22, %s4859_s22   ;;  %s3763_s1 = sphi %s3943_s1, %s4858_s1  }
  0x27   : > { %4776 = sst [smem:[#allocation30_spill]] %s3767_s22  ;;  %p2491_p0 = scmp.ge.s32.totalorder %s3815_s0, 1 }
  0x28   : > { %4777 = sst [smem:[#allocation31_spill]] %s3771_s23  ;;  %p4736_p1 = scmp.eq.s32.totalorder %s4014_s21, 0 }
  0x29   : > { %4778 = sst [smem:[#allocation32_spill]] %s3787_s3  ;;  %p525_p2 = scmp.lt.s32.totalorder %s3815_s0, 5 }
  0x2a   : > { %4779 = sst [smem:[#allocation33_spill]] %s3791_s26  ;;  %s3817_s19 = smov [#allocation9]  }
  0x2b   : > { %4780 = sst [smem:[#allocation34_spill]] %s3799_s28  ;;  %p4019_p3 = pnand %p2491_p0, %p525_p2 }
  0x2c   : > { %4781 = sst [smem:[#allocation35_spill]] %s3803_s4  ;;  %s537_s17 = sshll.u32 %s3817_s19, 4  ;;  %s4023_s17 = int_to_ptr.vmem [resolvable:$true] %s537_s17 }
  0x2d   : > { %s4782_s20 = scalar_select %p4019_p3, 1, 0 }
  0x2e   : > { %p3116_p4 = pneg %p4019_p3  ;;  %s3818_s4 = smov [#allocation12]  }
  0x2f   : > { %4783 = sst [smem:[#allocation36_spill]] %s4782_s20  ;;  %s578_s7 = sshll.u32 %s3818_s4, 4  ;;  %s4033_s7 = int_to_ptr.vmem [resolvable:$true] %s578_s7 }
  0x30   : > { %p4029_p5 = pnand %p3116_p4, %p4736_p1  ;;  %s3819_s6 = smov [#allocation15]  }
  0x31   : > { %s4035_s15 = sshll.u32 %s3819_s6, 4  ;;  %s4785_s19 = sld [smem:[#allocation41_spill]]  ;;  %s611_s15 = int_to_ptr.vmem [resolvable:$true] %s4035_s15 }
  0x32   : > { %s4784_s28 = scalar_select %p4029_p5, 1, 0 }
  0x33   : > { %p4045_p7 = pneg %p4029_p5 }
  0x37   : > { %s3359_s11 = scalar_lea.hbm %s4785_s19, 256 }
  0x38   : > { %p3360_p6 = scmp.ne.s32.totalorder %s4785_s19, %s3359_s11  ;;  %p3366_p10 = scmp.lt.u32.totalorder %s3359_s11, %s4785_s19 }
  0x3a   : > { %p3362_p8 = pnand %p4045_p7, %p3360_p6 }
  0x3c   : > { %p3363_p9 = pneg %p3362_p8 }
  0x3e   : > { %p3368_p11 = pnand %p3366_p10, %p3363_p9 }
  0x40   : > { %3371 = shalt.err (!%p3368_p11)
}
  0x41   : > { %s3372_s5 = scalar_lea.vmem %s4023_s17, 256  ;;  %p3380_p2 = scmp.lt.s32.totalorder %s4023_s17, %s4023_s17 }
  0x42   : > { %p3373_p12 = scmp.ne.s32.totalorder %s4023_s17, %s3372_s5  ;;  %p3381_p4 = scmp.lt.s32.totalorder %s3372_s5, %s3372_s5 }
  0x44   : > { %p3375_p13 = pnand %p3373_p12, %p4045_p7  ;;  %p3382_p6 = por %p3381_p4, %p3380_p2 }
  0x46   : > { %p3376_p0 = pneg %p3375_p13 }
  0x48   : > { %p3383_p8 = pnand %p3382_p6, %p3376_p0 }
  0x4a   : > { %3386 = shalt.err (!%p3383_p8)
}
  0x4b   : > { %s4738_s9 = smov 128   ;;  %s4740_s11 = smov 8  }
  0x4c   : > { %3119 = dma.hbm_to_vmem [thread:$0]  (!%p4029_p5), %s4785_s19, 256, %s4023_s17, [#allocation10], %s4738_s9, %s4738_s9, %s4740_s11  }
  0x4d   : > { %s4787_s10 = sld [smem:[#allocation48_spill]] }
  0x53   : > { %s3387_s5 = scalar_lea.hbm %s4787_s10, 2048 }
  0x54   : > { %p3388_p9 = scmp.ne.s32.totalorder %s4787_s10, %s3387_s5  ;;  %p3394_p12 = scmp.lt.u32.totalorder %s3387_s5, %s4787_s10 }
  0x56   : > { %p3390_p10 = pnand %p3388_p9, %p4045_p7 }
  0x58   : > { %p3391_p11 = pneg %p3390_p10 }
  0x5a   : > { %p3396_p13 = pnand %p3394_p12, %p3391_p11 }
  0x5c   : > { %3399 = shalt.err (!%p3396_p13)
}
  0x5d   : > { %s3400_s17 = scalar_lea.vmem %s4033_s7, 2048  ;;  %p3408_p6 = scmp.lt.s32.totalorder %s4033_s7, %s4033_s7 }
  0x5e   : > { %p3401_p0 = scmp.ne.s32.totalorder %s4033_s7, %s3400_s17  ;;  %p3409_p8 = scmp.lt.s32.totalorder %s3400_s17, %s3400_s17 }
  0x60   : > { %p3403_p2 = pnand %p3401_p0, %p4045_p7  ;;  %p3410_p9 = por %p3409_p8, %p3408_p6 }
  0x62   : > { %p3404_p4 = pneg %p3403_p2 }
  0x64   : > { %p3411_p10 = pnand %p3410_p9, %p3404_p4 }
  0x66   : > { %3414 = shalt.err (!%p3411_p10)
}
  0x67   : > { %3125 = dma.hbm_to_vmem [thread:$0]  (!%p4029_p5), %s4787_s10, 2048, %s4033_s7, [#allocation13], %s4738_s9, %s4738_s9, %s4740_s11  }
  0x68   : > { %s4788_s14 = sld [smem:[#allocation52_spill]] }
  0x6e   : > { %s3415_s13 = scalar_lea.hbm %s4788_s14, 2048 }
  0x6f   : > { %p3416_p11 = scmp.ne.s32.totalorder %s4788_s14, %s3415_s13  ;;  %p3422_p0 = scmp.lt.u32.totalorder %s3415_s13, %s4788_s14 }
  0x71   : > { %p3418_p12 = pnand %p3416_p11, %p4045_p7 }
  0x73   : > { %p3419_p13 = pneg %p3418_p12 }
  0x75   : > { %p3424_p2 = pnand %p3422_p0, %p3419_p13 }
  0x77   : > { %3427 = shalt.err (!%p3424_p2)
}
  0x78   : > { %s3428_s17 = scalar_lea.vmem %s611_s15, 2048  ;;  %p3436_p9 = scmp.lt.s32.totalorder %s611_s15, %s611_s15 }
  0x79   : > { %p3429_p4 = scmp.ne.s32.totalorder %s611_s15, %s3428_s17  ;;  %p3437_p10 = scmp.lt.s32.totalorder %s3428_s17, %s3428_s17 }
  0x7b   : > { %p3431_p6 = pnand %p3429_p4, %p4045_p7  ;;  %p3438_p1 = por %p3437_p10, %p3436_p9 }
  0x7d   : > { %p3432_p8 = pneg %p3431_p6 }
  0x7f   : > { %p3439_p3 = pnand %p3438_p1, %p3432_p8 }
  0x81   : > { %3442 = shalt.err (!%p3439_p3)
}
  0x82   : > { %3131 = dma.hbm_to_vmem [thread:$0]  (!%p4029_p5), %s4788_s14, 2048, %s611_s15, [#allocation16], %s4738_s9, %s4738_s9, %s4740_s11  }
  0x83   : > { %p4743_p1 = scmp.eq.s32.totalorder %s3815_s0, 0  ;;  %p97_p3 = scmp.ne.s32.totalorder %s3783_s25, %s3779_s2 }
  0x84   : > { %p103_p11 = scmp.ne.s32.totalorder %s3779_s2, %s3775_s24  ;;  %p4742_p12 = scmp.lt.s32.totalorder %s3815_s0, 4 }
  0x85   : > { %p99_p13 = por %p97_p3, %p4743_p1  ;;  %s679_s3 = sand.u32 1, %s3815_s0  }
  0x86   : > { %p4789_p0 = scmp.eq.s32.totalorder %s4014_s21, 0  ;;  %s681_s13 = sand.u32 1, %s3783_s25  }
  0x87   : > { %s2550_s20 = sshll.u32 %s3811_s30, 8  ;;  %s2503_s4 = sshll.u32 %s681_s13, 4 }
  0x88   : > { %p4129_p2 = por %p103_p11, %p4789_p0  ;;  %s4791_s17 = sld [smem:[#allocation39_spill]] }
  0x89   : > { %p4142_p4 = pnand %p4742_p12, %p99_p13  ;;  %s683_s7 = scalar_lea.vmem [#allocation6], %s2503_s4 }
  0x8a   : > { %s4790_s26 = scalar_select %p4129_p2, 1, 0 }
  0x8b   : > { %s690_s22 = sshll.u32 %s683_s7, 4  ;;  %s4148_s13 = scalar_lea.sflag [#allocation7], %s679_s3  ;;  %s4146_s22 = int_to_ptr.vmem [resolvable:$true] %s690_s22 }
  0x8c   : > { %p3445_p8 = pneg %p4142_p4 }
  0x8e   : > { %s4138_s15 = scalar_lea.hbm %s4791_s17, %s2550_s20  ;;  %s3448_s23 = scalar_lea.hbm %s4791_s17, 512 }
  0x8f   : > { %s3443_s6 = scalar_lea.hbm %s4138_s15, 256  ;;  %p3449_p3 = scmp.lt.u32.totalorder %s4138_s15, %s4791_s17 }
  0x90   : > { %p3444_p6 = scmp.ne.s32.totalorder %s4138_s15, %s3443_s6  ;;  %p3450_p11 = scmp.lt.u32.totalorder %s3448_s23, %s3443_s6 }
  0x91   : > { %p3452_p0 = scmp.lt.u32.totalorder %s3443_s6, %s4138_s15 }
  0x92   : > { %p3446_p9 = pnand %p3445_p8, %p3444_p6  ;;  %p3451_p13 = por %p3450_p11, %p3449_p3 }
  0x94   : > { %p3447_p10 = pneg %p3446_p9  ;;  %p3453_p12 = por %p3452_p0, %p3451_p13 }
  0x96   : > { %p3454_p1 = pnand %p3453_p12, %p3447_p10 }
  0x98   : > { %3457 = shalt.err (!%p3454_p1)
}
  0x99   : > { %s3458_s3 = scalar_lea.vmem %s4146_s22, 256  ;;  %s3822_s4 = smov [#allocation6]  }
  0x9a   : > { %p3459_p6 = scmp.ne.s32.totalorder %s4146_s22, %s3458_s3  ;;  %s3463_s7 = sshll.u32 %s3822_s4, 4  ;;  %s3464_s7 = int_to_ptr.vmem [resolvable:$false] %s3463_s7 }
  0x9b   : > { %s3465_s9 = scalar_lea.vmem %s3464_s7, 512  ;;  %p3466_p5 = scmp.lt.s32.totalorder %s4146_s22, %s3464_s7 }
  0x9c   : > { %p3461_p9 = pnand %p3459_p6, %p3445_p8  ;;  %p3467_p3 = scmp.lt.s32.totalorder %s3465_s9, %s3458_s3 }
  0x9e   : > { %p3462_p2 = pneg %p3461_p9  ;;  %p3468_p11 = por %p3467_p3, %p3466_p5 }
  0xa0   : > { %p3469_p13 = pnand %p3468_p11, %p3462_p2 }
  0xa2   : > { %3472 = shalt.err (!%p3469_p13)
}
  0xa3   : > { %s4793_s11 = smov 8   ;;  %s4794_s23 = smov 128  }
  0xa4   : > { %3144 = dma.hbm_to_vmem [thread:$0]  (!%p4142_p4), %s4138_s15, 256, %s4146_s22, %s4148_s13, %s4794_s23, %s4794_s23, %s4793_s11  }
  0xa5   : > { %s3823_s6 = smov [#allocation11]   ;;  %s3824_s5 = smov [#allocation14]  }
  0xa6   : > { %s562_s20 = sshll.u32 %s3823_s6, 4  ;;  %s594_s4 = sshll.u32 %s3824_s5, 4  ;;  %s563_s20 = int_to_ptr.vmem [resolvable:$true] %s562_s20  ;;  %s595_s4 = int_to_ptr.vmem [resolvable:$true] %s594_s4 }
  0xa7   : > { %s4795_s8 = sld [smem:[#allocation46_spill]] }
  0xad   : > { %s3473_s9 = scalar_lea.hbm %s4795_s8, 2048 }
  0xae   : > { %p3474_p5 = scmp.ne.s32.totalorder %s4795_s8, %s3473_s9  ;;  %p3480_p2 = scmp.lt.u32.totalorder %s3473_s9, %s4795_s8 }
  0xb0   : > { %p3476_p1 = pnand %p3474_p5, %p4045_p7 }
  0xb2   : > { %p3477_p12 = pneg %p3476_p1 }
  0xb4   : > { %p3482_p4 = pnand %p3480_p2, %p3477_p12 }
  0xb6   : > { %3485 = shalt.err (!%p3482_p4)
}
  0xb7   : > { %s3486_s15 = scalar_lea.vmem %s563_s20, 2048  ;;  %p3494_p6 = scmp.lt.s32.totalorder %s563_s20, %s563_s20 }
  0xb8   : > { %p3487_p8 = scmp.ne.s32.totalorder %s563_s20, %s3486_s15  ;;  %p3495_p9 = scmp.lt.s32.totalorder %s3486_s15, %s3486_s15 }
  0xba   : > { %p3489_p10 = pnand %p3487_p8, %p4045_p7  ;;  %p3496_p3 = por %p3495_p9, %p3494_p6 }
  0xbc   : > { %p3490_p0 = pneg %p3489_p10 }
  0xbe   : > { %p3497_p11 = pnand %p3496_p3, %p3490_p0 }
  0xc0   : > { %3500 = shalt.err (!%p3497_p11)
}
  0xc1   : > { %p4796_p13 = scmp.ne.s32.totalorder %s4784_s28, 0  ;;  %s4797_s12 = sld [smem:[#allocation50_spill]] }
  0xc3   : > { %3122 = dma.hbm_to_vmem [thread:$0]  (!%p4796_p13), %s4795_s8, 2048, %s563_s20, [#allocation10], %s4794_s23, %s4794_s23, %s4793_s11  }
  0xc7   : > { %s3501_s6 = scalar_lea.hbm %s4797_s12, 2048 }
  0xc8   : > { %p3502_p5 = scmp.ne.s32.totalorder %s4797_s12, %s3501_s6  ;;  %p3508_p2 = scmp.lt.u32.totalorder %s3501_s6, %s4797_s12 }
  0xca   : > { %p3504_p1 = pnand %p3502_p5, %p4045_p7 }
  0xcc   : > { %p3505_p12 = pneg %p3504_p1 }
  0xce   : > { %p3510_p4 = pnand %p3508_p2, %p3505_p12 }
  0xd0   : > { %3513 = shalt.err (!%p3510_p4)
}
  0xd1   : > { %s3514_s24 = scalar_lea.vmem %s595_s4, 2048  ;;  %p3522_p6 = scmp.lt.s32.totalorder %s595_s4, %s595_s4 }
  0xd2   : > { %p3515_p8 = scmp.ne.s32.totalorder %s595_s4, %s3514_s24  ;;  %p3523_p9 = scmp.lt.s32.totalorder %s3514_s24, %s3514_s24 }
  0xd4   : > { %p3517_p10 = pnand %p3515_p8, %p4045_p7  ;;  %p3524_p3 = por %p3523_p9, %p3522_p6 }
  0xd6   : > { %p3518_p0 = pneg %p3517_p10 }
  0xd8   : > { %p3525_p11 = pnand %p3524_p3, %p3518_p0 }
  0xda   : > { %3528 = shalt.err (!%p3525_p11)
}
  0xdb   : > { %3128 = dma.hbm_to_vmem [thread:$0]  (!%p4796_p13), %s4797_s12, 2048, %s595_s4, [#allocation13], %s4794_s23, %s4794_s23, %s4793_s11  }
  0xdc   : > { %s3825_s10 = smov [#allocation17]   ;;  %s4798_s16 = sld [smem:[#allocation54_spill]] }
  0xdd   : > { %s626_s14 = sshll.u32 %s3825_s10, 4  ;;  %s627_s14 = int_to_ptr.vmem [resolvable:$true] %s626_s14 }
  0xe2   : > { %s3529_s6 = scalar_lea.hbm %s4798_s16, 4096 }
  0xe3   : > { %p3530_p5 = scmp.ne.s32.totalorder %s4798_s16, %s3529_s6  ;;  %p3536_p2 = scmp.lt.u32.totalorder %s3529_s6, %s4798_s16 }
  0xe5   : > { %p3532_p1 = pnand %p3530_p5, %p4045_p7 }
  0xe7   : > { %p3533_p12 = pneg %p3532_p1 }
  0xe9   : > { %p3538_p4 = pnand %p3536_p2, %p3533_p12 }
  0xeb   : > { %3541 = shalt.err (!%p3538_p4)
}
  0xec   : > { %s3542_s4 = scalar_lea.vmem %s627_s14, 4096  ;;  %p3550_p6 = scmp.lt.s32.totalorder %s627_s14, %s627_s14 }
  0xed   : > { %p3543_p8 = scmp.ne.s32.totalorder %s627_s14, %s3542_s4  ;;  %p3551_p9 = scmp.lt.s32.totalorder %s3542_s4, %s3542_s4 }
  0xef   : > { %p3545_p10 = pnand %p3543_p8, %p4045_p7  ;;  %p3552_p3 = por %p3551_p9, %p3550_p6 }
  0xf1   : > { %p3546_p0 = pneg %p3545_p10 }
  0xf3   : > { %p3553_p11 = pnand %p3552_p3, %p3546_p0 }
  0xf5   : > { %3556 = shalt.err (!%p3553_p11)
}
  0xf6   : > { %s3826_s24 = smov 256   ;;  %s3827_s20 = smov 16  }
  0xf7   : > { %3134 = dma.hbm_to_vmem [thread:$0]  (!%p4796_p13), %s4798_s16, 4096, %s627_s14, [#allocation16], %s3826_s24, %s3826_s24, %s3827_s20  }
  0xf8   : > { %s3828_s17 = smov [#allocation18]   ;;  %s4799_s18 = sld [smem:[#allocation56_spill]] }
  0xf9   : > { %s642_s22 = sshll.u32 %s3828_s17, 4  ;;  %s643_s22 = int_to_ptr.vmem [resolvable:$true] %s642_s22 }
  0xfe   : > { %s3557_s7 = scalar_lea.hbm %s4799_s18, 4096 }
  0xff   : > { %p3558_p5 = scmp.ne.s32.totalorder %s4799_s18, %s3557_s7  ;;  %p3564_p2 = scmp.lt.u32.totalorder %s3557_s7, %s4799_s18 }
 0x101   : > { %p3560_p1 = pnand %p3558_p5, %p4045_p7 }
 0x103   : > { %p3561_p12 = pneg %p3560_p1 }
 0x105   : > { %p3566_p4 = pnand %p3564_p2, %p3561_p12 }
 0x107   : > { %3569 = shalt.err (!%p3566_p4)
}
 0x108   : > { %s3570_s14 = scalar_lea.vmem %s643_s22, 4096  ;;  %p3578_p6 = scmp.lt.s32.totalorder %s643_s22, %s643_s22 }
 0x109   : > { %p3571_p8 = scmp.ne.s32.totalorder %s643_s22, %s3570_s14  ;;  %p3579_p9 = scmp.lt.s32.totalorder %s3570_s14, %s3570_s14 }
 0x10b   : > { %p3573_p10 = pnand %p3571_p8, %p4045_p7  ;;  %p3580_p3 = por %p3579_p9, %p3578_p6 }
 0x10d   : > { %p3574_p0 = pneg %p3573_p10 }
 0x10f   : > { %p3581_p11 = pnand %p3580_p3, %p3574_p0 }
 0x111   : > { %3584 = shalt.err (!%p3581_p11)
}
 0x112   : > { %s4800_s1 = sld [smem:[#allocation33_spill]]  ;;  %s4801_s20 = sld [smem:[#allocation32_spill]] }
 0x113   : > { %3137 = dma.hbm_to_vmem [thread:$0]  (!%p4796_p13), %s4799_s18, 4096, %s643_s22, [#allocation19], %s4794_s23, %s4794_s23, %s4793_s11  }
 0x114   : > { %s2490_s28 = sadd.s32 4294967294, %s3815_s0   ;;  %s52_s15 = sadd.s32 1, %s3807_s29 }
 0x115   : > { %s55_s10 = sadd.s32 1, %s3811_s30  ;;  %p53_p7 = scmp.ge.s32.totalorder %s52_s15, 2 }
 0x116   : > { %s64_s17 = sadd.s32 1, %s3795_s27  ;;  %p4802_p13 = scmp.eq.s32.totalorder %s3815_s0, 0 }
 0x117   : > { %s4873_s15 = smov (%p53_p7, %s52_s15), 0  ;;  %s4875_s10 = smov (!%p53_p7, %s55_s10), %s3811_s30 }
 0x118   : > { %p71_p5 = scmp.ne.s32.totalorder %s3795_s27, %s4800_s1  ;;  %p77_p1 = scmp.ne.s32.totalorder %s4800_s1, %s4801_s20 }
 0x119   : > { %s4273_s6 = ssub.s32 %s3807_s29, %s4873_s15  ;;  %p57_p2 = scmp.ge.s32.totalorder %s4875_s10, 2 }
 0x11a   : > { %p4277_p12 = por %p4802_p13, %p71_p5  ;;  %p4804_p4 = scmp.eq.s32.totalorder %s4014_s21, 0 }
 0x11b   : > { %p512_p0 = scmp.eq.s32.totalorder %s4014_s21, 3  ;;  %s4877_s10 = smov (%p57_p2, %s4875_s10), 0 }
 0x11c   : > { %p4286_p8 = por %p4804_p4, %p77_p1  ;;  %4806 = sst [smem:[#allocation37_spill]] %s4877_s10 }
 0x11d   : > { %p4294_p6 = por %p512_p0, %p71_p5  ;;  %p518_p9 = scmp.eq.s32.totalorder %s2490_s28, 3 }
 0x11e   : > { %s4805_s23 = scalar_select %p4286_p8, 1, 0 }
 0x11f   : > { %s4807_s22 = scalar_select %p4294_p6, 1, 0 }
 0x120   : > { %s59_s5 = ssub.s32 %s3811_s30, %s4877_s10  ;;  %s659_s7 = sand.u32 1, %s3795_s27  }
 0x121   : > { %s61_s3 = sor.u32 %s4273_s6, %s59_s5  ;;  %p88_p3 = scmp.eq.s32.totalorder %s59_s5, 0 }
 0x122   : > { %p62_p11 = scmp.eq.s32.totalorder %s61_s3, 0  ;;  %p4305_p7 = por %p518_p9, %p77_p1 }
 0x123   : > { %s4809_s4 = sadd.s32 1, %s3783_s25  ;;  %s2500_s24 = sshll.u32 %s659_s7, 3 }
 0x124   : > { %s4808_s9 = scalar_select %p4305_p7, 1, 0 }
 0x125   : > { %s4312_s14 = scalar_select %p88_p3, %s3783_s25, %s4809_s4  }
 0x126   : > { %s4315_s8 = scalar_select %p62_p11, %s3795_s27, %s64_s17  }
 0x127   : > { %s2501_s12 = sshll.u32 %s3811_s30, 1  ;;  %s663_s16 = scalar_lea.vmem [#allocation3], %s2500_s24 }
 0x128   : > { %s668_s28 = sadd.s32 %s3807_s29, %s2501_s12  ;;  %s672_s18 = sshll.u32 %s663_s16, 4  ;;  %s4319_s18 = int_to_ptr.vmem [resolvable:$true] %s672_s18 }
 0x129   : > { %s2502_s19 = sshll.u32 %s668_s28, 7  ;;  %s4810_s1 = sld [smem:[#allocation38_spill]] }
 0x12a   : > { %p4812_p5 = scmp.lt.s32.totalorder %s3815_s0, 4  ;;  %s660_s12 = scalar_lea.sflag [#allocation4], %s659_s7 }
 0x12c   : > { %p4330_p1 = pnand %p4812_p5, %p4277_p12 }
 0x12e   : > { %p3587_p2 = pneg %p4330_p1 }
 0x12f   : > { %s4811_s20 = smov %s4810_s1  ;;  %s4324_s10 = scalar_lea.hbm %s4810_s1, %s2502_s19 }
 0x130   : > { %s3585_s16 = scalar_lea.hbm %s4324_s10, 128  ;;  %s3590_s4 = scalar_lea.hbm %s4811_s20, 512 }
 0x131   : > { %p3586_p13 = scmp.ne.s32.totalorder %s4324_s10, %s3585_s16  ;;  %p3591_p12 = scmp.lt.u32.totalorder %s4324_s10, %s4811_s20 }
 0x132   : > { %p3592_p9 = scmp.lt.u32.totalorder %s3590_s4, %s3585_s16  ;;  %p3594_p11 = scmp.lt.u32.totalorder %s3585_s16, %s4324_s10 }
 0x133   : > { %p3588_p4 = pnand %p3587_p2, %p3586_p13 }
 0x134   : > { %p3593_p3 = por %p3592_p9, %p3591_p12 }
 0x135   : > { %p3589_p0 = pneg %p3588_p4 }
 0x136   : > { %p3595_p5 = por %p3594_p11, %p3593_p3 }
 0x138   : > { %p3596_p10 = pnand %p3595_p5, %p3589_p0 }
 0x13a   : > { %3599 = shalt.err (!%p3596_p10)
}
 0x13b   : > { %s3600_s7 = scalar_lea.vmem %s4319_s18, 128  ;;  %s3829_s5 = smov [#allocation3]  }
 0x13c   : > { %p3601_p13 = scmp.ne.s32.totalorder %s4319_s18, %s3600_s7  ;;  %s3605_s3 = sshll.u32 %s3829_s5, 4  ;;  %s3606_s3 = int_to_ptr.vmem [resolvable:$false] %s3605_s3 }
 0x13d   : > { %s3607_s1 = scalar_lea.vmem %s3606_s3, 256  ;;  %p3608_p6 = scmp.lt.s32.totalorder %s4319_s18, %s3606_s3 }
 0x13e   : > { %p3603_p4 = pnand %p3601_p13, %p3587_p2  ;;  %p3609_p12 = scmp.lt.s32.totalorder %s3607_s1, %s3600_s7 }
 0x140   : > { %p3604_p7 = pneg %p3603_p4  ;;  %p3610_p9 = por %p3609_p12, %p3608_p6 }
 0x142   : > { %p3611_p3 = pnand %p3610_p9, %p3604_p7 }
 0x144   : > { %3614 = shalt.err (!%p3611_p3)
}
 0x145   : > { %s4814_s16 = sld [smem:[#allocation31_spill]]  ;;  %s4815_s19 = sld [smem:[#allocation30_spill]] }
 0x146   : > { %s4816_s11 = sld [smem:[#allocation29_spill]]  ;;  %p4817_p10 = scmp.eq.s32.totalorder %s4273_s6, 0 }
 0x147   : > { %3141 = dma.hbm_to_vmem [thread:$0]  (!%p4330_p1), %s4324_s10, 128, %s4319_s18, %s660_s12  }
 0x148   : > { %s2507_s28 = sshll.u32 %s3807_s29, 7  ;;  %p4818_p2 = scmp.eq.s32.totalorder %s3815_s0, 0 }
 0x149   : > { %p4819_p11 = scmp.eq.s32.totalorder %s4014_s21, 0  ;;  %s4821_s20 = sld [smem:[#allocation40_spill]] }
 0x14a   : > { %p4822_p1 = scmp.lt.s32.totalorder %s3815_s0, 4 }
 0x14b   : > { %s116_s4 = sadd.s32 1, %s4814_s16  ;;  %p123_p6 = scmp.ne.s32.totalorder %s4814_s16, %s4815_s19 }
 0x14c   : > { %s4363_s24 = scalar_select %p4817_p10, %s4814_s16, %s116_s4  }
 0x14d   : > { %p129_p7 = scmp.ne.s32.totalorder %s4815_s19, %s4816_s11  ;;  %s702_s17 = sand.u32 1, %s4814_s16  }
 0x14e   : > { %p125_p0 = por %p123_p6, %p4818_p2  ;;  %s2506_s5 = sshll.u32 %s702_s17, 3 }
 0x14f   : > { %p4375_p5 = por %p129_p7, %p4819_p11  ;;  %s4382_s18 = scalar_lea.hbm %s4821_s20, %s2507_s28 }
 0x150   : > { %p4386_p13 = pnand %p4822_p1, %p125_p0  ;;  %s704_s6 = scalar_lea.vmem [#allocation8], %s2506_s5 }
 0x151   : > { %s4820_s7 = scalar_select %p4375_p5, 1, 0 }
 0x152   : > { %s711_s12 = sshll.u32 %s704_s6, 4  ;;  %s3615_s16 = scalar_lea.hbm %s4382_s18, 128  ;;  %s712_s12 = int_to_ptr.vmem [resolvable:$true] %s711_s12 }
 0x153   : > { %p3616_p4 = scmp.ne.s32.totalorder %s4382_s18, %s3615_s16  ;;  %p3617_p12 = pneg %p4386_p13 }
 0x154   : > { %s3620_s4 = scalar_lea.hbm %s4821_s20, 256  ;;  %p3621_p10 = scmp.lt.u32.totalorder %s4382_s18, %s4821_s20 }
 0x155   : > { %p3618_p9 = pnand %p3617_p12, %p3616_p4  ;;  %p3622_p6 = scmp.lt.u32.totalorder %s3620_s4, %s3615_s16 }
 0x156   : > { %p3624_p2 = scmp.lt.u32.totalorder %s3615_s16, %s4382_s18 }
 0x157   : > { %p3619_p3 = pneg %p3618_p9  ;;  %p3623_p7 = por %p3622_p6, %p3621_p10 }
 0x159   : > { %p3625_p0 = por %p3624_p2, %p3623_p7 }
 0x15b   : > { %p3626_p11 = pnand %p3625_p0, %p3619_p3 }
 0x15d   : > { %3629 = shalt.err (!%p3626_p11)
}
 0x15e   : > { %s3630_s5 = scalar_lea.vmem %s712_s12, 128  ;;  %s3830_s3 = smov [#allocation8]  }
 0x15f   : > { %p3631_p1 = scmp.ne.s32.totalorder %s712_s12, %s3630_s5  ;;  %s3635_s1 = sshll.u32 %s3830_s3, 4  ;;  %s3636_s1 = int_to_ptr.vmem [resolvable:$false] %s3635_s1 }
 0x160   : > { %s3637_s6 = scalar_lea.vmem %s3636_s1, 256  ;;  %p3638_p5 = scmp.lt.s32.totalorder %s712_s12, %s3636_s1 }
 0x161   : > { %p3633_p4 = pnand %p3631_p1, %p3617_p12  ;;  %p3639_p8 = scmp.lt.s32.totalorder %s3637_s6, %s3630_s5 }
 0x163   : > { %p3634_p9 = pneg %p3633_p4  ;;  %p3640_p6 = por %p3639_p8, %p3638_p5 }
 0x165   : > { %p3641_p10 = pnand %p3640_p6, %p3634_p9 }
 0x167   : > { %3644 = shalt.err (!%p3641_p10)
}
 0x168   : > { %3147 = dma.hbm_to_vmem [thread:$0]  (!%p4386_p13), %s4382_s18, 128, %s712_s12, %s4148_s13  }
 0x169   : > { %s4824_s16 = sld [smem:[#allocation36_spill]] }
 0x16f   : > { %p4825_p3 = scmp.ne.s32.totalorder %s4824_s16, 0 }
 0x170   : > { %s4826_s19 = sld [smem:[#allocation33_spill]] (!%p4825_p3)  ;;  %p4827_p8 = scmp.ne.s32.totalorder (!%p4825_p3), %s4805_s23, 0 }
 0x171   : > { %720 = sbr.rel (%p4825_p3) target bundleno = 4432 (0x1150), region = 100 }
 0x176   : > { %s4415_s11 = sand.u32 (!%p4825_p3), 1, %s4826_s19  }
 0x177   : > { %s2509_s4 = sshll.u32 (!%p4825_p3), %s4415_s11, 3  ;;  %s723_s17 = scalar_lea.sflag (!%p4825_p3), [#allocation4], %s4415_s11 }
 0x178   : > { %s726_s28 = scalar_lea.vmem [#allocation3], %s2509_s4 }
 0x179   : > { %3730 = dma.done.wait (%p4827_p8), %s723_s17, 128  }
 0x17a   : > { %3732 = vsyncadd (%p4827_p8), %s723_s17, 4294967168  ;;  %s731_s13 = sand.u32 1, %s4014_s21   ;;  %s733_s18 = sand.u32 1, %s3779_s2  }
 0x17b   : > { %s2510_s10 = sshll.u32 %s733_s18, 4  ;;  %s732_s12 = scalar_lea.sflag [#allocation7], %s731_s13 }
 0x17c   : > { %s735_s5 = scalar_lea.vmem [#allocation6], %s2510_s10  ;;  %p4828_p5 = scmp.ne.s32.totalorder %s4790_s26, 0 }
 0x17e   : > { %3734 = dma.done.wait (%p4828_p5), %s732_s12, 256  }
 0x17f   : > { %3736 = vsyncadd (%p4828_p5), %s732_s12, 4294967040  ;;  %s4829_s3 = sld [smem:[#allocation30_spill]]  ;;  %p4830_p13 = scmp.ne.s32.totalorder %s4820_s7, 0 }
 0x185   : > { %s742_s1 = sand.u32 1, %s4829_s3  }
 0x186   : > { %s2511_s6 = sshll.u32 %s742_s1, 3 }
 0x187   : > { %s744_s16 = scalar_lea.vmem [#allocation8], %s2511_s6 }
 0x188   : > { %3738 = dma.done.wait (%p4830_p13), %s732_s12, 128  }
 0x189   : > { %3740 = vsyncadd (%p4830_p13), %s732_s12, 4294967168  ;;  %p4831_p12 = scmp.eq.s32.totalorder %s4014_s21, 0 }
 0x18b   : > { %3742 = dma.done.wait (%p4831_p12), [#allocation10], 2304   ;;  %p4832_p7 = pmov %p4831_p12 }
 0x18d   : > { %3744 = vsyncadd (%p4832_p7), [#allocation10], 4294964992  ;;  %p4833_p2 = pmov %p4832_p7 }
 0x18f   : > { %3746 = dma.done.wait (%p4833_p2), [#allocation13], 4096   ;;  %p4834_p0 = pmov %p4833_p2 }
 0x191   : > { %3748 = vsyncadd (%p4834_p0), [#allocation13], 4294963200  ;;  %p4835_p11 = pmov %p4834_p0 }
 0x192   : > { %p4836_p1 = pmov %p4834_p0 }
 0x193   : > { %3750 = dma.done.wait (%p4835_p11), [#allocation16], 6144  }
 0x194   : > { %3752 = vsyncadd (%p4836_p1), [#allocation16], 4294961152  ;;  %p4837_p4 = pmov %p4834_p0 }
 0x195   : > { %p4838_p9 = pmov %p4834_p0 }
 0x196   : > { %3754 = dma.done.wait (%p4837_p4), [#allocation19], 4096  }
 0x197   : > { %3756 = vsyncadd (%p4838_p9), [#allocation19], 4294963200  ;;  %v840_v0 = vld [vmem:[%s735_s5] sm:$0xff]  ;;  %v841_v2 = vld [vmem:[%s735_s5 + $0x8] sm:$0xff]  ;;  %v3831_v29 = vmov 0.0|0.0   ;;  %vm3832_vm0 = vmmov 0  }
 0x198   : > { %v847_v1 = vld [vmem:[#allocation9] sm:$0xff]  ;;  %v845_v3 = vmul.f32 11.313708, %v840_v0  ;;  %v846_v4 = vmul.f32 11.313708, %v841_v2  ;;  %v848_v6 = vld [vmem:[#allocation9 + $0x8] sm:$0xff]  ;;  %2876 = vmatprep.subr.bf16.mxu0 %v3831_v29 }
 0x199   : > { %v839_v5 = vld [vmem:[%s726_s28] sm:$0xff]  ;;  %v843_v8 = vld [vmem:[%s744_s16] sm:$0xff]  ;;  %s4839_s23 = sld [smem:[#allocation42_spill]]  ;;  %s4840_s17 = sld [smem:[#allocation43_spill]]  ;;  %vm1215_vm7 = vcmask 261120   ;;  %vm1296_vm9 = vcmask 130048  }
 0x19a   : > { %v842_v7 = vmul.f32 11.313708, %v839_v5  ;;  %v849_v9 = vadd.f32 %v847_v1, %v845_v3  ;;  %v850_v11 = vadd.f32 %v848_v6, %v846_v4  ;;  %v926_v24 = vld [vmem:[#allocation11] sm:$0xff]  ;;  %v927_v25 = vld [vmem:[#allocation11 + $0x8] sm:$0xff]  ;;  %v928_v31 = vld [vmem:[#allocation11 + $0x10] sm:$0xff]  ;;  %s4841_s18 = sld [smem:[#allocation49_spill]] }
 0x19b   : > { %v1019_v26 = vld [vmem:[#allocation12] sm:$0xff]  ;;  %v2877_v27 = vpack.c.bf16 %v927_v25, %v926_v24  ;;  %v1020_v28 = vld [vmem:[#allocation12 + $0x8] sm:$0xff]  ;;  %v929_v32 = vld [vmem:[#allocation11 + $0x18] sm:$0xff]  ;;  %s4844_s5 = sld [smem:[#allocation47_spill]]  ;;  %s4845_s6 = sld [smem:[#allocation51_spill]]  ;;  %vm1561_vm10 = vcmask 523520  }
 0x19c   : > { %v4452_v10 = vadd.f32 %v843_v8, %v842_v7  ;;  %886 = vadd.xlane.f32.xlu0 %v849_v9  ;;  %v2900_v30 = vpack.c.bf16 %v1020_v28, %v1019_v26  ;;  %v1021_v33 = vld [vmem:[#allocation12 + $0x10] sm:$0xff]  ;;  %v2880_v34 = vpack.c.bf16 %v929_v32, %v928_v31  ;;  %v1022_v35 = vld [vmem:[#allocation12 + $0x18] sm:$0xff]  ;;  %v930_v37 = vld [vmem:[#allocation11 + $0x20] sm:$0xff]  ;;  %s3834_s16 = smov 96   ;;  %s3835_s21 = smov 64   ;;  %vm1740_vm11 = vcmask 785920  }
 0x19d   : > { %2878 = vmatpush3.bf16.msra.mxu0 %v2877_v27  ;;  %v2904_v36 = vpack.c.bf16 %v1022_v35, %v1021_v33  ;;  %v931_v38 = vld [vmem:[#allocation11 + $0x28] sm:$0xff]  ;;  %v1023_v39 = vld [vmem:[#allocation12 + $0x20] sm:$0xff]  ;;  %v932_v43 = vld [vmem:[#allocation11 + $0x30] sm:$0xff]  ;;  %s3836_s26 = smov 32   ;;  %vm1919_vm12 = vcmask 1048320   ;;  %s4846_s19 = sld [smem:[#allocation53_spill]] }
 0x19e   : > { %853 = vadd.xlane.f32.xlu1 %v4452_v10  ;;  %2901 = vmatprep.subr.bf16.mxu1 %v2900_v30  ;;  %v2883_v40 = vpack.c.bf16 %v931_v38, %v930_v37  ;;  %v1024_v41 = vld [vmem:[#allocation12 + $0x28] sm:$0xff]  ;;  %v933_v44 = vld [vmem:[#allocation11 + $0x38] sm:$0xff]  ;;  %v1025_v45 = vld [vmem:[#allocation12 + $0x30] sm:$0xff]  ;;  %s4847_s13 = sld [smem:[#allocation44_spill]]  ;;  %s4848_s12 = sld [smem:[#allocation45_spill]] }
 0x19f   : > { %2879 = vmatprep.subr.bf16.mxu0 %v3831_v29  ;;  %2903 = vmatpush3.bf16.msra.mxu1 %v2900_v30  ;;  %v2908_v42 = vpack.c.bf16 %v1024_v41, %v1023_v39  ;;  %v2886_v46 = vpack.c.bf16 %v933_v44, %v932_v43  ;;  %v1026_v47 = vld [vmem:[#allocation12 + $0x38] sm:$0xff]  ;;  %v934_v49 = vld [vmem:[#allocation11 + $0x40] sm:$0xff]  ;;  %v935_v50 = vld [vmem:[#allocation11 + $0x48] sm:$0xff]  ;;  %s4850_s3 = sld [smem:[#allocation34_spill]]  ;;  %s838_s28 = scalar_lea.vmem [#allocation20], %s2509_s4 }
 0x1a0   : > { %888 = vadd.xlane.f32.xlu0 %v850_v11  ;;  %2905 = vmatprep.subr.bf16.mxu1 %v2904_v36  ;;  %v2912_v48 = vpack.c.bf16 %v1026_v47, %v1025_v45  ;;  %v1027_v51 = vld [vmem:[#allocation12 + $0x40] sm:$0xff]  ;;  %v2889_v52 = vpack.c.bf16 %v935_v50, %v934_v49  ;;  %v1028_v53 = vld [vmem:[#allocation12 + $0x48] sm:$0xff]  ;;  %v936_v54 = vld [vmem:[#allocation11 + $0x50] sm:$0xff]  ;;  %p4854_p10 = scmp.ne.s32.totalorder %s4807_s22, 0  ;;  %s3837_s4 = smov [#allocation20]  }
 0x1a1   : > { %2881 = vmatpush3.bf16.msra.mxu0 %v2880_v34  ;;  %v937_v55 = vld [vmem:[#allocation11 + $0x58] sm:$0xff]  ;;  %v2916_v56 = vpack.c.bf16 %v1028_v53, %v1027_v51  ;;  %v1029_v57 = vld [vmem:[#allocation12 + $0x50] sm:$0xff]  ;;  %v1031_v61 = vld [vmem:[#allocation12 + $0x60] sm:$0xff] }
 0x1a2   : > { %2882 = vmatprep.subr.bf16.mxu0 %v3831_v29  ;;  %v1030_v58 = vld [vmem:[#allocation12 + $0x58] sm:$0xff]  ;;  %v2892_v59 = vpack.c.bf16 %v937_v55, %v936_v54  ;;  %v1032_v62 = vld [vmem:[#allocation12 + $0x68] sm:$0xff]  ;;  %v938_v63 = vld [vmem:[#allocation11 + $0x60] sm:$0xff] }
 0x1a3   : > { %2907 = vmatpush3.bf16.msra.mxu1 %v2904_v36  ;;  %v2920_v60 = vpack.c.bf16 %v1030_v58, %v1029_v57  ;;  %v939_v0 = vld [vmem:[#allocation11 + $0x68] sm:$0xff]  ;;  %v2924_v1 = vpack.c.bf16 %v1032_v62, %v1031_v61  ;;  %v1033_v3 = vld [vmem:[#allocation12 + $0x70] sm:$0xff]  ;;  %v1034_v4 = vld [vmem:[#allocation12 + $0x78] sm:$0xff] }
 0x1a4   : > { %2909 = vmatprep.subr.bf16.mxu1 %v2908_v42  ;;  %v2895_v2 = vpack.c.bf16 %v939_v0, %v938_v63  ;;  %v940_v5 = vld [vmem:[#allocation11 + $0x70] sm:$0xff]  ;;  %v941_v6 = vld [vmem:[#allocation11 + $0x78] sm:$0xff]  ;;  %v2928_v7 = vpack.c.bf16 %v1034_v4, %v1033_v3  ;;  %v2521_v45 = vld [vmem:[%s4840_s17] ss:$0 sm:$0xff] }
 0x1a5   : > { %2884 = vmatpush3.bf16.msra.mxu0 %v2883_v40  ;;  %v2898_v8 = vpack.c.bf16 %v941_v6, %v940_v5  ;;  %v1119_v53 = vld [vmem:[#allocation14 + $0x10] sm:$0xff]  ;;  %v1120_v54 = vld [vmem:[#allocation14 + $0x18] sm:$0xff]  ;;  %v1121_v58 = vld [vmem:[#allocation14 + $0x20] sm:$0xff] }
 0x1a6   : > { %2885 = vmatprep.subr.bf16.mxu0 %v3831_v29  ;;  %v2936_v57 = vpack.c.bf16 %v1120_v54, %v1119_v53  ;;  %v1125_v62 = vld [vmem:[#allocation14 + $0x40] sm:$0xff]  ;;  %v1126_v63 = vld [vmem:[#allocation14 + $0x48] sm:$0xff]  ;;  %vm4502_vm8 = vmpackc.low %vm1215_vm7, %vm1215_vm7 }
 0x1a7   : > { %2911 = vmatpush3.bf16.msra.mxu1 %v2908_v42  ;;  %v2520_v42 = vld [vmem:[%s4839_s23] ss:$0 sm:$0xff]  ;;  %v2948_v0 = vpack.c.bf16 %v1126_v63, %v1125_v62  ;;  %v1129_v4 = vld [vmem:[#allocation14 + $0x60] sm:$0xff] }
 0x1a8   : > { %2913 = vmatprep.subr.bf16.mxu1 %v2912_v48  ;;  %v1130_v5 = vld [vmem:[#allocation14 + $0x68] sm:$0xff] }
 0x1a9   : > { %2887 = vmatpush3.bf16.msra.mxu0 %v2886_v46  ;;  %v2956_v6 = vpack.c.bf16 %v1130_v5, %v1129_v4 }
 0x1aa   : > { %2888 = vmatprep.subr.bf16.mxu0 %v3831_v29 }
 0x1ab   : > { %2915 = vmatpush3.bf16.msra.mxu1 %v2912_v48 }
 0x1ac   : > { %2917 = vmatprep.subr.bf16.mxu1 %v2916_v56 }
 0x1ad   : > { %2890 = vmatpush3.bf16.msra.mxu0 %v2889_v52 }
 0x1ae   : > { %2891 = vmatprep.subr.bf16.mxu0 %v3831_v29 }
 0x1af   : > { %2919 = vmatpush3.bf16.msra.mxu1 %v2916_v56 }
 0x1b0   : > { %2921 = vmatprep.subr.bf16.mxu1 %v2920_v60 }
 0x1b1   : > { %2893 = vmatpush3.bf16.msra.mxu0 %v2892_v59  ;;  %v1122_v59 = vld [vmem:[#allocation14 + $0x28] sm:$0xff] }
 0x1b2   : > { %2894 = vmatprep.subr.bf16.mxu0 %v3831_v29 }
 0x1b3   : > { %2923 = vmatpush3.bf16.msra.mxu1 %v2920_v60  ;;  %v1124_v60 = vld [vmem:[#allocation14 + $0x38] sm:$0xff] }
 0x1b4   : > { %2925 = vmatprep.subr.bf16.mxu1 %v2924_v1 }
 0x1b5   : > { %2896 = vmatpush3.bf16.msra.mxu0 %v2895_v2  ;;  %v1128_v2 = vld [vmem:[#allocation14 + $0x58] sm:$0xff] }
 0x1b6   : > { %2897 = vmatprep.subr.bf16.mxu0 %v3831_v29 }
 0x1b7   : > { %2927 = vmatpush3.bf16.msra.mxu1 %v2924_v1  ;;  %v1127_v1 = vld [vmem:[#allocation14 + $0x50] sm:$0xff] }
 0x1b8   : > { %2929 = vmatprep.subr.bf16.mxu1 %v2928_v7  ;;  %v2952_v3 = vpack.c.bf16 %v1128_v2, %v1127_v1 }
 0x1b9   : > { %2899 = vmatpush3.bf16.msra.mxu0 %v2898_v8  ;;  %v1132_v8 = vld [vmem:[#allocation14 + $0x78] sm:$0xff] }
 0x1bb   : > { %2931 = vmatpush3.bf16.msra.mxu1 %v2928_v7  ;;  %v1131_v7 = vld [vmem:[#allocation14 + $0x70] sm:$0xff] }
 0x1bc   : > { %2964 = vmatprep.subr.bf16.mxu1 %v3831_v29 }
 0x229   : > { %v887_v12 = vpop.xlane.xlu0 %886 }
 0x22a   : > { %v890_v13 = vmul.f32 0.0078125, %v887_v12  ;;  %v3833_v12 = vmov 0.0  }
 0x22b   : > { %v854_v14 = vpop.xlane.xlu1 %853  ;;  %2712 = vmatprep.mubr.msk.f32.mxu0 %vm3832_vm0, %v3833_v12 }
 0x22c   : > { %v856_v15 = vmul.f32 0.0078125, %v854_v14  ;;  %v4455_v16 = vsub.f32 %v849_v9, %v890_v13  ;;  %v1117_v9 = vld [vmem:[#allocation14] sm:$0xff] }
 0x22d   : > { %v889_v17 = vpop.xlane.xlu0 %888 }
 0x22e   : > { %v4458_v18 = vsub.f32 %v4452_v10, %v856_v15  ;;  %v891_v19 = vmul.f32 0.0078125, %v889_v17  ;;  %v894_v20 = vmul.f32 %v4455_v16, %v4455_v16  ;;  %v920_v43 = vmul.f32 %v2520_v42, %v4455_v16 }
 0x230   : > { %v4462_v21 = vsub.f32 %v850_v11, %v891_v19  ;;  %896 = vadd.xlane.f32.xlu1 %v894_v20  ;;  %v858_v22 = vmul.f32 %v4458_v18, %v4458_v18  ;;  %v1118_v11 = vld [vmem:[#allocation14 + $0x8] sm:$0xff]  ;;  %v877_v50 = vmul.f32 %v2520_v42, %v4458_v18  ;;  %v2940_v18 = vpack.c.bf16 %v1122_v59, %v1121_v58 }
 0x231   : > { %v4478_v13 = vpack.c.bf16 %v1118_v11, %v1117_v9  ;;  %v2960_v9 = vpack.c.bf16 %v1132_v8, %v1131_v7  ;;  %v2523_v11 = vld [vmem:[%s4841_s18] ss:$0 sm:$0xff] }
 0x232   : > { %v895_v23 = vmul.f32 %v4462_v21, %v4462_v21  ;;  %v921_v47 = vmul.f32 %v2520_v42, %v4462_v21  ;;  %v1123_v21 = vld [vmem:[#allocation14 + $0x30] sm:$0xff] }
 0x233   : > { %2933 = vmatprep.subr.bf16.mxu0 %v4478_v13  ;;  %v2944_v61 = vpack.c.bf16 %v1124_v60, %v1123_v21 }
 0x234   : > { %898 = vadd.xlane.f32.xlu0 %v895_v23  ;;  %859 = vadd.xlane.f32.xlu1 %v858_v22 }
 0x2bd   : > { %v897_v14 = vpop.xlane.xlu1 %896 }
 0x2be   : > { %v900_v15 = vmul.f32 0.007874016, %v897_v14 }
 0x2c0   : > { %3327 = vrsqrt.f32 %v900_v15  ;;  %vm904_vm1 = vcmp.eq.f32.partialorder %v900_v15, inf  ;;  %v907_v25 = vand.u32 2147483648, %v900_v15  ;;  %vm906_vm2 = vcmp.eq.f32.partialorder %v900_v15, 0.0 }
 0x2c1   : > { %v899_v17 = vpop.xlane.xlu0 %898  ;;  %v860_v19 = vpop.xlane.xlu1 %859 }
 0x2c2   : > { %v901_v20 = vmul.f32 0.007874016, %v899_v17  ;;  %v861_v22 = vmul.f32 0.007874016, %v860_v19 }
 0x2c4   : > { %3329 = vrsqrt.f32 %v901_v20  ;;  %vm911_vm3 = vcmp.eq.f32.partialorder %v901_v20, inf  ;;  %vm913_vm4 = vcmp.eq.f32.partialorder %v901_v20, 0.0  ;;  %v914_v33 = vand.u32 2147483648, %v901_v20 }
 0x2c5   : > { %3331 = vrsqrt.f32 %v861_v22  ;;  %vm864_vm5 = vcmp.eq.f32.partialorder %v861_v22, inf  ;;  %v867_v36 = vand.u32 2147483648, %v861_v22  ;;  %vm866_vm6 = vcmp.eq.f32.partialorder %v861_v22, 0.0 }
 0x2ca   : > { %v3328_v23 = vpop.eup %3327 }
 0x2cb   : > { %v903_v24 = vmul.f32 %v3328_v23, %v900_v15 }
 0x2cd   : > { %v905_v26 = vsel %vm904_vm1, %v900_v15, %v903_v24 }
 0x2ce   : > { %v3330_v27 = vpop.eup %3329  ;;  %v908_v28 = vsel %vm906_vm2, %v907_v25, %v905_v26  ;;  %v2522_v25 = vld [vmem:[%s4844_s5] ss:$0 sm:$0xff]  ;;  %s4849_s5 = sld [smem:[#allocation35_spill]] }
 0x2cf   : > { %v3332_v30 = vpop.eup %3331  ;;  %v910_v31 = vmul.f32 %v3330_v27, %v901_v20  ;;  %v916_v32 = vadd.f32 1e-06, %v908_v28  ;;  %v2524_v27 = vld [vmem:[%s4845_s6] ss:$0 sm:$0xff]  ;;  %s3649_s6 = sshll.u32 %s3837_s4, 4  ;;  %s3650_s6 = int_to_ptr.vmem [resolvable:$false] %s3649_s6 }
 0x2d0   : > { %v863_v34 = vmul.f32 %v3332_v30, %v861_v22 }
 0x2d1   : > { %v912_v35 = vsel %vm911_vm3, %v901_v20, %v910_v31  ;;  %3333 = vrcp.f32 %v916_v32 }
 0x2d2   : > { %v865_v37 = vsel %vm864_vm5, %v861_v22, %v863_v34  ;;  %v915_v38 = vsel %vm913_vm4, %v914_v33, %v912_v35 }
 0x2d3   : > { %v868_v39 = vsel %vm866_vm6, %v867_v36, %v865_v37  ;;  %v917_v40 = vadd.f32 1e-06, %v915_v38 }
 0x2d4   : > { %v869_v41 = vadd.f32 1e-06, %v868_v39 }
 0x2d5   : > { %3335 = vrcp.f32 %v917_v40 }
 0x2d6   : > { %3337 = vrcp.f32 %v869_v41 }
 0x2db   : > { %v3334_v44 = vpop.eup %3333 }
 0x2dc   : > { %v922_v46 = vmul.f32 %v3334_v44, %v920_v43 }
 0x2de   : > { %v924_v48 = vadd.f32 %v2521_v45, %v922_v46 }
 0x2df   : > { %v3336_v49 = vpop.eup %3335 }
 0x2e0   : > { %v3338_v51 = vpop.eup %3337  ;;  %2747 = vmatprep.mubr.f32.mxu1 %v924_v48  ;;  %v923_v52 = vmul.f32 %v3336_v49, %v921_v47 }
 0x2e1   : > { %v878_v55 = vmul.f32 %v3338_v51, %v877_v50 }
 0x2e2   : > { %v925_v56 = vadd.f32 %v2521_v45, %v923_v52 }
 0x2e3   : > { %v885_v16 = vadd.f32 %v2521_v45, %v878_v55 }
 0x2e4   : > { %2748 = vmatmul.mubr.f32.vlgmr.msra.gmra.mrb[0].mxu1 %v925_v56 }
 0x2e5   : > { %2713 = vmatmul.mubr.f32.vlgmr.msra.gmra.mrb[0].mxu0 %v885_v16  ;;  %2789 = vmatprep.mubr.msk.f32.mxu1 %vm3832_vm0, %v3833_v12 }
 0x2e6   : > { %2935 = vmatpush3.bf16.msra.mxu0 %v4478_v13  ;;  %2782 = vmatprep.mubr.f32.mxu0 %v924_v48 }
 0x2e7   : > { %2937 = vmatprep.subr.bf16.mxu0 %v2936_v57 }
 0x2ea   : > { %2939 = vmatpush3.bf16.msra.mxu0 %v2936_v57 }
 0x2eb   : > { %2941 = vmatprep.subr.bf16.mxu0 %v2940_v18 }
 0x2ee   : > { %2943 = vmatpush3.bf16.msra.mxu0 %v2940_v18 }
 0x2ef   : > { %2945 = vmatprep.subr.bf16.mxu0 %v2944_v61 }
 0x2f2   : > { %2947 = vmatpush3.bf16.msra.mxu0 %v2944_v61 }
 0x2f3   : > { %2949 = vmatprep.subr.bf16.mxu0 %v2948_v0 }
 0x2f6   : > { %2951 = vmatpush3.bf16.msra.mxu0 %v2948_v0 }
 0x2f7   : > { %2953 = vmatprep.subr.bf16.mxu0 %v2952_v3 }
 0x2fa   : > { %2955 = vmatpush3.bf16.msra.mxu0 %v2952_v3 }
 0x2fb   : > { %2957 = vmatprep.subr.bf16.mxu0 %v2956_v6 }
 0x2fe   : > { %2959 = vmatpush3.bf16.msra.mxu0 %v2956_v6 }
 0x2ff   : > { %2961 = vmatprep.subr.bf16.mxu0 %v2960_v9 }
 0x302   : > { %2963 = vmatpush3.bf16.msra.mxu0 %v2960_v9 }
 0x303   : > { %2992 = vmatprep.subr.bf16.mxu0 %v3831_v29 }
 0x305   : > { %2783 = vmatmul.mubr.f32.vlgmr.msra.gmra.mrb[2].mxu0 %v925_v56 }
 0x306   : > { %2873 = vmatprep.mubr.msk.f32.mxu0 %vm3832_vm0, %v3833_v12 }
 0x3b7   : > { %v2749_v13 = vpop.f32.mrb[0].mxu1 }
 0x3b8   : > { %v1015_v14 = vpop.f32.mrb[0].mxu0  ;;  %v1114_v15 = vadd.f32 %v2749_v13, %v2523_v11  ;;  %v1108_v17 = vpop.f32.mrb[1].mxu1 }
 0x3b9   : > { %v2714_v19 = vpop.f32.mrb[1].mxu0  ;;  %v1109_v20 = vadd.f32 %v2523_v11, %v1108_v17  ;;  %v4514_v26 = vadd.f32 %v2522_v25, %v1015_v14 }
 0x3bb   : > { %v2965_v23 = vpack.c.bf16 %v1114_v15, %v1109_v20  ;;  %v4506_v24 = vpack.i.bf16 %v1114_v15, %v1109_v20 }
 0x3bd   : > { %2967 = vmatpush3.bf16.xpose.msk.msra.mxu1 %vm4502_vm8, %v2965_v23 }
 0x3be   : > { %2968 = vmatprep.subr.bf16.mxu1 %v3831_v29 }
 0x3c4   : > { %2790 = vmatmul.mubr.msk.f32.vlgmr.msra.gmra.mrb[2].mxu1 %vm1215_vm7, %v4514_v26 }
 0x3c5   : > { %2796 = vmatprep.mubr.msk.f32.mxu1 %vm3832_vm0, %v3833_v12 }
 0x3d8   : > { %v2784_v28 = vpop.f32.mrb[2].mxu0 }
 0x3d9   : > { %v1212_v30 = vadd.f32 %v2784_v28, %v2524_v27  ;;  %v1206_v31 = vpop.f32.mrb[3].mxu0 }
 0x3da   : > { %v1207_v32 = vadd.f32 %v2524_v27, %v1206_v31 }
 0x3dc   : > { %v2969_v33 = vpack.c.bf16 %v1212_v30, %v1207_v32  ;;  %v4523_v34 = vpack.i.bf16 %v1212_v30, %v1207_v32 }
 0x3de   : > { %2970 = vmatpush3.bf16.msra.mxu1 %v2969_v33 }
 0x3df   : > { %2971 = vmatprep.subr.bf16.mxu1 %v3831_v29 }
 0x497   : > { %v1291_v35 = vpop.f32.mrb[2].mxu1 }
 0x498   : > { %v1295_v36 = vmul.f32 0.17677669, %v1291_v35  ;;  %v2791_v37 = vpop.f32.mrb[3].mxu1 }
 0x49a   : > { %v1297_v38 = vsel %vm1296_vm9, %v1295_v36, -inf }
 0x49b   : > { %1298 = vmax.xlane.f32.xlu0 %v1297_v38 }
 0x4b1   : > { %3298 = vrot.lane.b32.xlu0 %v4506_v24, %s3834_s16 }
 0x528   : > { %v1299_v39 = vpop.xlane.xlu0 %1298 }
 0x529   : > { %v1300_v40 = vsub.f32 %v1295_v36, %v1299_v39 }
 0x52b   : > { %v1301_v41 = vmul.f32 1.442695, %v1300_v40 }
 0x52c   : > { %v3299_v45 = vpop.permute.xlu0 %3298 }
 0x52d   : > { %3339 = vpow2.f32 %v1301_v41  ;;  %v3301_v46 = vunpack.i.h.bf16 %v3299_v45  ;;  %v3300_v47 = vunpack.i.l.bf16 %v3299_v45 }
 0x52f   : > { %v2972_v50 = vpack.c.bf16 %v3301_v46, %v3300_v47 }
 0x537   : > { %v3340_v42 = vpop.eup %3339 }
 0x538   : > { %v1303_v43 = vsel %vm1296_vm9, %v3340_v42, 0.0 }
 0x539   : > { %1304 = vadd.xlane.f32.xlu1 %v1303_v43 }
 0x54a   : > { %1382 = vrot.lane.b32.xlu1 %v4514_v26, %s3834_s16 }
 0x5c6   : > { %v1305_v44 = vpop.xlane.xlu1 %1304 }
 0x5c7   : > { %3341 = vrcp.f32 %v1305_v44 }
 0x5ca   : > { %v1383_v51 = vpop.permute.xlu1 %1382 }
 0x5d1   : > { %v3342_v48 = vpop.eup %3341 }
 0x5d2   : > { %v1307_v49 = vmul.f32 %v3342_v48, %v3340_v42 }
 0x5d4   : > { %2797 = vmatmul.mubr.msk.f32.vlgmr.msra.gmra.mrb[4].mxu1 %vm1296_vm9, %v1307_v49 }
 0x5d5   : > { %2974 = vmatpush3.bf16.xpose.msk.msra.mxu1 %vm4502_vm8, %v2972_v50  ;;  %2803 = vmatprep.mubr.msk.f32.mxu1 %vm3832_vm0, %v3833_v12 }
 0x5d6   : > { %2975 = vmatprep.subr.bf16.mxu1 %v3831_v29 }
 0x5dc   : > { %2804 = vmatmul.mubr.msk.f32.vlgmr.msra.gmra.mrb[6].mxu1 %vm1215_vm7, %v1383_v51 }
 0x5dd   : > { %2810 = vmatprep.mubr.msk.f32.mxu1 %vm3832_vm0, %v3833_v12 }
 0x6a7   : > { %v1377_v52 = vpop.f32.mrb[4].mxu1 }
 0x6a8   : > { %1381 = vst.msk [vmem:[#allocation2] sm:$0xff] %vm1215_vm7, %v1377_v52  ;;  %v2798_v53 = vpop.f32.mrb[5].mxu1 }
 0x6af   : > { %v1460_v54 = vpop.f32.mrb[6].mxu1 }
 0x6b0   : > { %v1464_v55 = vmul.f32 0.17677669, %v1460_v54  ;;  %v2805_v56 = vpop.f32.mrb[7].mxu1 }
 0x6b2   : > { %v1465_v16 = vsel %vm1296_vm9, %v1464_v55, -inf }
 0x6b3   : > { %1466 = vmax.xlane.f32.xlu1 %v1465_v16  ;;  %v1922_v16 = vld [vmem:[#allocation15] sm:$0xff] }
 0x6c4   : > { %3308 = vrot.lane.b32.xlu1 %v4506_v24, %s3835_s21 }
 0x6c8   : > { %1563 = vrot.lane.b32.xlu1 %v4514_v26, %s3835_s21 }
 0x740   : > { %v1467_v57 = vpop.xlane.xlu1 %1466 }
 0x741   : > { %v1468_v58 = vsub.f32 %v1464_v55, %v1467_v57  ;;  %v1923_v57 = vld [vmem:[#allocation15 + $0x8] sm:$0xff] }
 0x743   : > { %v1469_v59 = vmul.f32 1.442695, %v1468_v58  ;;  %v1924_v58 = vld [vmem:[#allocation15 + $0x10] sm:$0xff] }
 0x744   : > { %v3309_v1 = vpop.permute.xlu1 %3308 }
 0x745   : > { %3343 = vpow2.f32 %v1469_v59  ;;  %v3311_v3 = vunpack.i.h.bf16 %v3309_v1  ;;  %v3310_v4 = vunpack.i.l.bf16 %v3309_v1  ;;  %v2993_v59 = vpack.c.bf16 %v1923_v57, %v1922_v16  ;;  %v2066_v16 = vld [vmem:[#allocation17 + $0x80] sm:$0xff]  ;;  %v2068_v57 = vld [vmem:[#allocation17 + $0x90] sm:$0xff] }
 0x747   : > { %v2979_v6 = vpack.c.bf16 %v3311_v3, %v3310_v4  ;;  %2994 = vmatpush3.bf16.msra.mxu0 %v2993_v59  ;;  %v1932_v4 = vld [vmem:[#allocation15 + $0x50] sm:$0xff]  ;;  %v3034_v59 = vpack.c.bf16 %v2068_v57, %v2066_v16 }
 0x748   : > { %v1564_v7 = vpop.permute.xlu1 %1563  ;;  %2995 = vmatprep.subr.bf16.mxu0 %v3831_v29 }
 0x74f   : > { %v3344_v18 = vpop.eup %3343 }
 0x750   : > { %v1471_v21 = vsel %vm1296_vm9, %v3344_v18, 0.0 }
 0x751   : > { %1472 = vadd.xlane.f32.xlu0 %v1471_v21 }
 0x767   : > { %3303 = vrot.lane.b32.xlu0 %v4523_v34, %s3834_s16 }
 0x7de   : > { %v1473_v60 = vpop.xlane.xlu0 %1472 }
 0x7df   : > { %3345 = vrcp.f32 %v1473_v60  ;;  %v1926_v60 = vld [vmem:[#allocation15 + $0x20] sm:$0xff] }
 0x7e2   : > { %v3304_v61 = vpop.permute.xlu0 %3303 }
 0x7e3   : > { %v3306_v62 = vunpack.i.h.bf16 %v3304_v61  ;;  %v3305_v63 = vunpack.i.l.bf16 %v3304_v61  ;;  %v1927_v61 = vld [vmem:[#allocation15 + $0x28] sm:$0xff] }
 0x7e5   : > { %v2976_v0 = vpack.c.bf16 %v3306_v62, %v3305_v63  ;;  %v2999_v62 = vpack.c.bf16 %v1927_v61, %v1926_v60  ;;  %v1928_v63 = vld [vmem:[#allocation15 + $0x30] sm:$0xff] }
 0x7e6   : > { %v2072_v60 = vld [vmem:[#allocation17 + $0xb0] sm:$0xff] }
 0x7e7   : > { %2977 = vmatpush3.bf16.msra.mxu1 %v2976_v0  ;;  %v1929_v0 = vld [vmem:[#allocation15 + $0x38] sm:$0xff] }
 0x7e8   : > { %2978 = vmatprep.subr.bf16.mxu1 %v3831_v29  ;;  %v3002_v1 = vpack.c.bf16 %v1929_v0, %v1928_v63  ;;  %v2077_v63 = vld [vmem:[#allocation17 + $0xd8] sm:$0xff] }
 0x7e9   : > { %v3346_v2 = vpop.eup %3345 }
 0x7ea   : > { %v1475_v5 = vmul.f32 %v3346_v2, %v3344_v18  ;;  %v1925_v18 = vld [vmem:[#allocation15 + $0x18] sm:$0xff]  ;;  %v1931_v2 = vld [vmem:[#allocation15 + $0x48] sm:$0xff] }
 0x7eb   : > { %v2996_v21 = vpack.c.bf16 %v1925_v18, %v1924_v58  ;;  %v2071_v58 = vld [vmem:[#allocation17 + $0xa8] sm:$0xff]  ;;  %v2073_v18 = vld [vmem:[#allocation17 + $0xb8] sm:$0xff] }
 0x7ec   : > { %2811 = vmatmul.mubr.msk.f32.vlgmr.msra.gmra.mrb[8].mxu1 %vm1296_vm9, %v1475_v5  ;;  %v1933_v5 = vld [vmem:[#allocation15 + $0x58] sm:$0xff]  ;;  %v3036_v61 = vpack.c.bf16 %v2073_v18, %v2071_v58 }
 0x7ed   : > { %2817 = vmatprep.mubr.msk.f32.mxu1 %vm3832_vm0, %v3833_v12  ;;  %2997 = vmatpush3.bf16.msra.mxu0 %v2996_v21  ;;  %v2070_v21 = vld [vmem:[#allocation17 + $0xa0] sm:$0xff] }
 0x7ee   : > { %2998 = vmatprep.subr.bf16.mxu0 %v3831_v29  ;;  %v3038_v0 = vpack.c.bf16 %v2072_v60, %v2070_v21  ;;  %v2542_v60 = vld [vmem:[%s4847_s13] ss:$0 sm:$0xff]  ;;  %s2294_s13 = sshll.u32 %s838_s28, 4  ;;  %s4629_s13 = int_to_ptr.vmem [resolvable:$true] %s2294_s13 }
 0x7ef   : > { %s3645_s1 = scalar_lea.vmem %s4629_s13, 128  ;;  %p3652_p5 = scmp.lt.s32.totalorder %s4629_s13, %s3650_s6 }
 0x7f0   : > { %2981 = vmatpush3.bf16.xpose.msk.msra.mxu1 %vm4502_vm8, %v2979_v6  ;;  %v3008_v6 = vpack.c.bf16 %v1933_v5, %v1932_v4  ;;  %v2081_v4 = vld [vmem:[#allocation17 + $0xf8] sm:$0xff]  ;;  %p3646_p6 = scmp.ne.s32.totalorder %s4629_s13, %s3645_s1 }
 0x7f1   : > { %2982 = vmatprep.subr.bf16.mxu1 %v3831_v29  ;;  %3000 = vmatpush3.bf16.msra.mxu0 %v2999_v62  ;;  %v2075_v62 = vld [vmem:[#allocation17 + $0xc8] sm:$0xff] }
 0x7f2   : > { %3001 = vmatprep.subr.bf16.mxu0 %v3831_v29  ;;  %p3647_p3 = pnand %p3646_p6, %p4854_p10 }
 0x7f4   : > { %p3648_p8 = pneg %p3647_p3 }
 0x7f5   : > { %3003 = vmatpush3.bf16.msra.mxu0 %v3002_v1  ;;  %v3040_v1 = vpack.c.bf16 %v2077_v63, %v2075_v62  ;;  %v2543_v63 = vld [vmem:[%s4848_s12] ss:$0 sm:$0xff]  ;;  %s4853_s12 = sld [smem:[#allocation58_spill]] }
 0x7f6   : > { %3004 = vmatprep.subr.bf16.mxu0 %v3831_v29 }
 0x7f7   : > { %2818 = vmatmul.mubr.msk.f32.vlgmr.msra.gmra.mrb[10].mxu1 %vm1215_vm7, %v1564_v7  ;;  %v1934_v7 = vld [vmem:[#allocation15 + $0x60] sm:$0xff] }
 0x7f8   : > { %2824 = vmatprep.mubr.msk.f32.mxu1 %vm3832_vm0, %v3833_v12 }
 0x8bf   : > { %v1553_v8 = vpop.f32.mrb[8].mxu1 }
 0x8c0   : > { %v2812_v9 = vpop.f32.mrb[9].mxu1 }
 0x8ca   : > { %v1641_v11 = vpop.f32.mrb[10].mxu1 }
 0x8cb   : > { %v1645_v13 = vmul.f32 0.17677669, %v1641_v11  ;;  %v2819_v14 = vpop.f32.mrb[11].mxu1  ;;  %v1936_v11 = vld [vmem:[#allocation15 + $0x70] sm:$0xff] }
 0x8cd   : > { %v1646_v15 = vsel %vm1296_vm9, %v1645_v13, -inf }
 0x8ce   : > { %1647 = vmax.xlane.f32.xlu1 %v1646_v15 }
 0x8df   : > { %3318 = vrot.lane.b32.xlu1 %v4506_v24, %s3836_s26 }
 0x8e3   : > { %1742 = vrot.lane.b32.xlu1 %v4514_v26, %s3836_s26 }
 0x95b   : > { %v1648_v17 = vpop.xlane.xlu1 %1647 }
 0x95c   : > { %v1649_v19 = vsub.f32 %v1645_v13, %v1648_v17  ;;  %v1937_v13 = vld [vmem:[#allocation15 + $0x78] sm:$0xff] }
 0x95d   : > { %v3014_v14 = vpack.c.bf16 %v1937_v13, %v1936_v11  ;;  %v2183_v11 = vld [vmem:[#allocation18 + $0x80] sm:$0xff]  ;;  %v2184_v13 = vld [vmem:[#allocation18 + $0x88] sm:$0xff] }
 0x95e   : > { %v1650_v20 = vmul.f32 1.442695, %v1649_v19 }
 0x95f   : > { %v3319_v32 = vpop.permute.xlu1 %3318 }
 0x960   : > { %3347 = vpow2.f32 %v1650_v20  ;;  %v3321_v33 = vunpack.i.h.bf16 %v3319_v32  ;;  %v3320_v35 = vunpack.i.l.bf16 %v3319_v32 }
 0x962   : > { %v2986_v37 = vpack.c.bf16 %v3321_v33, %v3320_v35  ;;  %v2053_v33 = vld [vmem:[#allocation17 + $0x18] sm:$0xff] }
 0x963   : > { %v1743_v38 = vpop.permute.xlu1 %1742 }
 0x96a   : > { %v3348_v23 = vpop.eup %3347 }
 0x96b   : > { %v1652_v25 = vsel %vm1296_vm9, %v3348_v23, 0.0 }
 0x96c   : > { %1653 = vadd.xlane.f32.xlu0 %v1652_v25 }
 0x982   : > { %3313 = vrot.lane.b32.xlu0 %v4523_v34, %s3835_s21 }
 0x9f9   : > { %v1654_v27 = vpop.xlane.xlu0 %1653 }
 0x9fa   : > { %3349 = vrcp.f32 %v1654_v27 }
 0x9fd   : > { %v3314_v28 = vpop.permute.xlu0 %3313 }
 0x9fe   : > { %v3316_v30 = vunpack.i.h.bf16 %v3314_v28  ;;  %v3315_v31 = vunpack.i.l.bf16 %v3314_v28 }
 0xa00   : > { %v2983_v24 = vpack.c.bf16 %v3316_v30, %v3315_v31 }
 0xa02   : > { %2984 = vmatpush3.bf16.msra.mxu1 %v2983_v24 }
 0xa03   : > { %2985 = vmatprep.subr.bf16.mxu1 %v3831_v29 }
 0xa04   : > { %v3350_v26 = vpop.eup %3349 }
 0xa05   : > { %v1656_v36 = vmul.f32 %v3350_v26, %v3348_v23  ;;  %v2541_v23 = vld [vmem:[%s4846_s19] ss:$0 sm:$0xff]  ;;  %s4852_s19 = sld [smem:[#allocation57_spill]] }
 0xa06   : > { %v2051_v26 = vld [vmem:[#allocation17 + $0x8] sm:$0xff] }
 0xa07   : > { %2825 = vmatmul.mubr.msk.f32.vlgmr.msra.gmra.mrb[12].mxu1 %vm1296_vm9, %v1656_v36  ;;  %v3016_v35 = vpack.c.bf16 %v2053_v33, %v2051_v26  ;;  %v2050_v36 = vld [vmem:[#allocation17] sm:$0xff] }
 0xa08   : > { %2831 = vmatprep.mubr.msk.f32.mxu1 %vm3832_vm0, %v3833_v12  ;;  %v2171_v33 = vld [vmem:[#allocation18 + $0x20] sm:$0xff] }
 0xa0b   : > { %2988 = vmatpush3.bf16.xpose.msk.msra.mxu1 %vm4502_vm8, %v2986_v37  ;;  %v2052_v37 = vld [vmem:[#allocation17 + $0x10] sm:$0xff] }
 0xa0c   : > { %2989 = vmatprep.subr.bf16.mxu1 %v3831_v29 }
 0xa12   : > { %2832 = vmatmul.mubr.msk.f32.vlgmr.msra.gmra.mrb[14].mxu1 %vm1215_vm7, %v1743_v38  ;;  %v3018_v38 = vpack.c.bf16 %v2052_v37, %v2050_v36  ;;  %v2189_v36 = vld [vmem:[#allocation18 + $0xb0] sm:$0xff]  ;;  %v2190_v37 = vld [vmem:[#allocation18 + $0xb8] sm:$0xff] }
 0xa13   : > { %2838 = vmatprep.mubr.msk.f32.mxu1 %vm3832_vm0, %v3833_v12 }
 0xada   : > { %v1732_v39 = vpop.f32.mrb[12].mxu1 }
 0xadb   : > { %v2826_v40 = vpop.f32.mrb[13].mxu1 }
 0xae5   : > { %v1820_v41 = vpop.f32.mrb[14].mxu1 }
 0xae6   : > { %v1824_v42 = vmul.f32 0.17677669, %v1820_v41  ;;  %v2833_v43 = vpop.f32.mrb[15].mxu1  ;;  %v2054_v41 = vld [vmem:[#allocation17 + $0x20] sm:$0xff] }
 0xae8   : > { %v1825_v44 = vsel %vm1296_vm9, %v1824_v42, -inf }
 0xae9   : > { %1826 = vmax.xlane.f32.xlu0 %v1825_v44  ;;  %v2059_v44 = vld [vmem:[#allocation17 + $0x48] sm:$0xff] }
 0xaff   : > { %3323 = vrot.lane.b32.xlu0 %v4523_v34, %s3836_s26 }
 0xb03   : > { %1737 = vrot.lane.b32.xlu0 %v1732_v39, %s3835_s21  ;;  %v2057_v39 = vld [vmem:[#allocation17 + $0x38] sm:$0xff]  ;;  %s2546_s21 = sshll.u32 %s4849_s5, 1 }
 0xb76   : > { %v1827_v22 = vpop.xlane.xlu0 %1826 }
 0xb77   : > { %v1828_v45 = vsub.f32 %v1824_v42, %v1827_v22  ;;  %v2056_v42 = vld [vmem:[#allocation17 + $0x30] sm:$0xff]  ;;  %v2061_v22 = vld [vmem:[#allocation17 + $0x58] sm:$0xff] }
 0xb78   : > { %v3022_v43 = vpack.c.bf16 %v2056_v42, %v2054_v41  ;;  %v2191_v41 = vld [vmem:[#allocation18 + $0xc0] sm:$0xff]  ;;  %v2192_v42 = vld [vmem:[#allocation18 + $0xc8] sm:$0xff] }
 0xb79   : > { %v1829_v46 = vmul.f32 1.442695, %v1828_v45  ;;  %v3024_v45 = vpack.c.bf16 %v2061_v22, %v2059_v44  ;;  %v3064_v44 = vpack.c.bf16 %v2192_v42, %v2191_v41  ;;  %v2175_v22 = vld [vmem:[#allocation18 + $0x40] sm:$0xff] }
 0xb7a   : > { %v3324_v47 = vpop.permute.xlu0 %3323 }
 0xb7b   : > { %3351 = vpow2.f32 %v1829_v46  ;;  %v3326_v48 = vunpack.i.h.bf16 %v3324_v47  ;;  %v3325_v49 = vunpack.i.l.bf16 %v3324_v47  ;;  %v2058_v46 = vld [vmem:[#allocation17 + $0x40] sm:$0xff]  ;;  %v2060_v47 = vld [vmem:[#allocation17 + $0x50] sm:$0xff] }
 0xb7d   : > { %v2990_v50 = vpack.c.bf16 %v3326_v48, %v3325_v49  ;;  %v3026_v48 = vpack.c.bf16 %v2060_v47, %v2058_v46  ;;  %v2063_v49 = vld [vmem:[#allocation17 + $0x68] sm:$0xff]  ;;  %v2193_v46 = vld [vmem:[#allocation18 + $0xd0] sm:$0xff]  ;;  %v2194_v47 = vld [vmem:[#allocation18 + $0xd8] sm:$0xff] }
 0xb7e   : > { %v1738_v54 = vpop.permute.xlu0 %1737 }
 0xb7f   : > { %2991 = vmatpush3.bf16.msra.mxu1 %v2990_v50  ;;  %v2065_v50 = vld [vmem:[#allocation17 + $0x78] sm:$0xff] }
 0xb80   : > { %3017 = vmatprep.subr.bf16.mxu1 %v3016_v35  ;;  %v2172_v35 = vld [vmem:[#allocation18 + $0x28] sm:$0xff] }
 0xb85   : > { %v3352_v51 = vpop.eup %3351 }
 0xb86   : > { %v1831_v52 = vsel %vm1296_vm9, %v3352_v51, 0.0 }
 0xb87   : > { %1832 = vadd.xlane.f32.xlu1 %v1831_v52  ;;  %v2062_v52 = vld [vmem:[#allocation17 + $0x60] sm:$0xff] }
 0xb98   : > { %1558 = vrot.lane.b32.xlu1 %v1553_v8, %s3836_s26  ;;  %v1935_v8 = vld [vmem:[#allocation15 + $0x68] sm:$0xff]  ;;  %s2290_s26 = sadd.s32 %s4850_s3, %s2546_s21  ;;  %s2279_s3 = scalar_lea.sflag [#allocation5], %s4415_s11 }
 0xb99   : > { %v3011_v9 = vpack.c.bf16 %v1935_v8, %v1934_v7  ;;  %v2078_v7 = vld [vmem:[#allocation17 + $0xe0] sm:$0xff]  ;;  %v2080_v8 = vld [vmem:[#allocation17 + $0xf0] sm:$0xff]  ;;  %s2547_s17 = sshll.u32 %s2290_s26, 7 }
 0xb9a   : > { %s4627_s5 = scalar_lea.hbm %s4853_s12, %s2547_s17 }
 0xc14   : > { %v1833_v53 = vpop.xlane.xlu1 %1832 }
 0xc15   : > { %3353 = vrcp.f32 %v1833_v53  ;;  %v2064_v53 = vld [vmem:[#allocation17 + $0x70] sm:$0xff] }
 0xc18   : > { %v1559_v34 = vpop.permute.xlu1 %1558 }
 0xc19   : > { %1562 = vst.msk [vmem:[#allocation2] sm:$0xff] %vm1561_vm10, %v1559_v34  ;;  %v3030_v34 = vpack.c.bf16 %v2064_v53, %v2062_v52  ;;  %v2195_v52 = vld [vmem:[#allocation18 + $0xe0] sm:$0xff]  ;;  %v2196_v53 = vld [vmem:[#allocation18 + $0xe8] sm:$0xff] }
 0xc1a   : > { %1741 = vst.msk [vmem:[#allocation2] sm:$0xff] %vm1740_vm11, %v1738_v54  ;;  %v2067_v54 = vld [vmem:[#allocation17 + $0x88] sm:$0xff] }
 0xc1f   : > { %v3354_v55 = vpop.eup %3353 }
 0xc20   : > { %v1835_v56 = vmul.f32 %v3354_v55, %v3352_v51  ;;  %v3028_v51 = vpack.c.bf16 %v2065_v50, %v2063_v49  ;;  %v2069_v55 = vld [vmem:[#allocation17 + $0x98] sm:$0xff]  ;;  %v3068_v49 = vpack.c.bf16 %v2194_v47, %v2193_v46  ;;  %v2177_v50 = vld [vmem:[#allocation18 + $0x50] sm:$0xff] }
 0xc22   : > { %2839 = vmatmul.mubr.msk.f32.vlgmr.msra.gmra.mrb[16].mxu1 %vm1296_vm9, %v1835_v56  ;;  %v3032_v56 = vpack.c.bf16 %v2069_v55, %v2067_v54  ;;  %v3072_v54 = vpack.c.bf16 %v2196_v53, %v2195_v52 }
 0xc23   : > { %2158 = vmatprep.mubr.f32.mxu1 %v3833_v12  ;;  %v1930_v12 = vld [vmem:[#allocation15 + $0x40] sm:$0xff]  ;;  %3019 = vmatpush1.bf16.msra.mxu1 %v3018_v38  ;;  %v3058_v38 = vpack.c.bf16 %v2172_v35, %v2171_v33 }
 0xc24   : > { %v3005_v3 = vpack.c.bf16 %v1931_v2, %v1930_v12  ;;  %v2074_v12 = vld [vmem:[#allocation17 + $0xc0] sm:$0xff]  ;;  %v2076_v2 = vld [vmem:[#allocation17 + $0xd0] sm:$0xff] }
 0xc25   : > { %v3042_v5 = vpack.c.bf16 %v2076_v2, %v2074_v12  ;;  %v2179_v12 = vld [vmem:[#allocation18 + $0x60] sm:$0xff]  ;;  %v2180_v2 = vld [vmem:[#allocation18 + $0x68] sm:$0xff] }
 0xc26   : > { %3006 = vmatpush3.bf16.msra.mxu0 %v3005_v3  ;;  %v2079_v3 = vld [vmem:[#allocation17 + $0xe8] sm:$0xff] }
 0xc27   : > { %3007 = vmatprep.subr.bf16.mxu0 %v3831_v29 }
 0xc2a   : > { %3009 = vmatpush3.bf16.msra.mxu0 %v3008_v6  ;;  %v3044_v6 = vpack.c.bf16 %v2081_v4, %v2079_v3  ;;  %v3074_v3 = vpack.c.bf16 %v2180_v2, %v2179_v12  ;;  %v2197_v4 = vld [vmem:[#allocation18 + $0xf0] sm:$0xff] }
 0xc2b   : > { %3010 = vmatprep.subr.bf16.mxu0 %v3831_v29 }
 0xc2e   : > { %3012 = vmatpush3.bf16.msra.mxu0 %v3011_v9  ;;  %v3046_v9 = vpack.c.bf16 %v2080_v8, %v2078_v7  ;;  %v2181_v7 = vld [vmem:[#allocation18 + $0x70] sm:$0xff]  ;;  %v2182_v8 = vld [vmem:[#allocation18 + $0x78] sm:$0xff] }
 0xc2f   : > { %3013 = vmatprep.subr.bf16.mxu0 %v3831_v29 }
 0xc32   : > { %3015 = vmatpush3.bf16.msra.mxu0 %v3014_v14  ;;  %v2167_v14 = vld [vmem:[#allocation18] sm:$0xff] }
 0xcf5   : > { %v1911_v15 = vpop.f32.mrb[16].mxu1 }
 0xcf6   : > { %1916 = vrot.lane.b32.xlu1 %v1911_v15, %s3834_s16  ;;  %v2840_v17 = vpop.f32.mrb[17].mxu1  ;;  %v3048_v15 = vpack.c.bf16 %v2184_v13, %v2183_v11  ;;  %s4851_s16 = sld [smem:[#allocation55_spill]] }
 0xcf7   : > { %v2168_v17 = vld [vmem:[#allocation18 + $0x8] sm:$0xff] }
 0xcf8   : > { %3049 = vmatprep.subr.bf16.mxu0 %v3048_v15 }
 0xd68   : > { %v1917_v19 = vpop.permute.xlu1 %1916 }
 0xd69   : > { %1920 = vst.msk [vmem:[#allocation2] sm:$0xff] %vm1919_vm12, %v1917_v19  ;;  %v2185_v19 = vld [vmem:[#allocation18 + $0x90] sm:$0xff] }
 0xd70   : > { %v1921_v20 = vld [vmem:[#allocation2] sm:$0xff] }
 0xd71   : > { %2874 = vmatmul.mubr.f32.vlgmr.msra.gmra.mrb[4].mxu0 %v1921_v20  ;;  %v2186_v20 = vld [vmem:[#allocation18 + $0x98] sm:$0xff] }
 0xe44   : > { %v2011_v25 = vpop.f32.mrb[4].mxu0 }
 0xe45   : > { %v2012_v27 = vadd.f32 %v2541_v23, %v2011_v25  ;;  %v2875_v28 = vpop.f32.mrb[5].mxu0  ;;  %v3050_v23 = vpack.c.bf16 %v2168_v17, %v2167_v14  ;;  %v3052_v25 = vpack.c.bf16 %v2186_v20, %v2185_v19  ;;  %v2082_v14 = vld [vmem:[%s4851_s16] sm:$0x3]  ;;  %s3651_s16 = scalar_lea.vmem %s3650_s6, 256 }
 0xe46   : > { %v2170_v28 = vld [vmem:[#allocation18 + $0x18] sm:$0xff]  ;;  %p3653_p13 = scmp.lt.s32.totalorder %s3651_s16, %s3645_s1 }
 0xe47   : > { %v4598_v30 = vadd.f32 %v2012_v27, %v4452_v10  ;;  %v2055_v10 = vld [vmem:[#allocation17 + $0x28] sm:$0xff]  ;;  %v2169_v27 = vld [vmem:[#allocation18 + $0x10] sm:$0xff]  ;;  %3051 = vmatpush3.bf16.msra.mxu0 %v3050_v23 }
 0xe48   : > { %v3020_v40 = vpack.c.bf16 %v2057_v39, %v2055_v10  ;;  %3053 = vmatprep.subr.bf16.mxu0 %v3052_v25  ;;  %v3060_v10 = vpack.c.bf16 %v2190_v37, %v2189_v36  ;;  %v2173_v39 = vld [vmem:[#allocation18 + $0x30] sm:$0xff]  ;;  %p3654_p12 = por %p3653_p13, %p3652_p5 }
 0xe49   : > { %2018 = vadd.xlane.f32.xlu0 %v4598_v30 }
 0xe4a   : > { %3021 = vmatprep.subr.bf16.mxu1 %v3020_v40  ;;  %v2174_v40 = vld [vmem:[#allocation18 + $0x38] sm:$0xff]  ;;  %p3655_p7 = pnand %p3654_p12, %p3648_p8 }
 0xe4b   : > { %3023 = vmatpush1.bf16.msra.mxu1 %v3022_v43  ;;  %v3062_v43 = vpack.c.bf16 %v2174_v40, %v2173_v39 }
 0xe4c   : > { %3025 = vmatprep.subr.bf16.mxu1 %v3024_v45  ;;  %v2176_v45 = vld [vmem:[#allocation18 + $0x48] sm:$0xff] }
 0xe4f   : > { %3027 = vmatpush1.bf16.msra.mxu1 %v3026_v48  ;;  %v3066_v48 = vpack.c.bf16 %v2176_v45, %v2175_v22 }
 0xe50   : > { %3029 = vmatprep.subr.bf16.mxu1 %v3028_v51  ;;  %v2178_v51 = vld [vmem:[#allocation18 + $0x58] sm:$0xff] }
 0xe53   : > { %3031 = vmatpush1.bf16.msra.mxu1 %v3030_v34  ;;  %v3070_v34 = vpack.c.bf16 %v2178_v51, %v2177_v50 }
 0xe54   : > { %3033 = vmatprep.subr.bf16.mxu1 %v3032_v56 }
 0xe57   : > { %3035 = vmatpush1.bf16.msra.mxu1 %v3034_v59 }
 0xe58   : > { %3037 = vmatprep.subr.bf16.mxu1 %v3036_v61 }
 0xe5b   : > { %3039 = vmatpush1.bf16.msra.mxu1 %v3038_v0 }
 0xe5c   : > { %3041 = vmatprep.subr.bf16.mxu1 %v3040_v1 }
 0xe5f   : > { %3043 = vmatpush1.bf16.msra.mxu1 %v3042_v5  ;;  %v2198_v5 = vld [vmem:[#allocation18 + $0xf8] sm:$0xff] }
 0xe60   : > { %3045 = vmatprep.subr.bf16.mxu1 %v3044_v6  ;;  %v3076_v6 = vpack.c.bf16 %v2198_v5, %v2197_v4 }
 0xe63   : > { %3047 = vmatpush1.bf16.msra.mxu1 %v3046_v9  ;;  %v3078_v9 = vpack.c.bf16 %v2182_v8, %v2181_v7 }
 0xed6   : > { %v2019_v29 = vpop.xlane.xlu0 %2018 }
 0xed7   : > { %v2020_v31 = vmul.f32 0.0078125, %v2019_v29  ;;  %v2187_v29 = vld [vmem:[#allocation18 + $0xa0] sm:$0xff] }
 0xed9   : > { %v4602_v24 = vsub.f32 %v4598_v30, %v2020_v31  ;;  %v2188_v31 = vld [vmem:[#allocation18 + $0xa8] sm:$0xff] }
 0xeda   : > { %v3056_v26 = vpack.c.bf16 %v2188_v31, %v2187_v29 }
 0xedb   : > { %v2022_v32 = vmul.f32 %v4602_v24, %v4602_v24  ;;  %v2041_v61 = vmul.f32 %v2542_v60, %v4602_v24  ;;  %v2084_v24 = vlaneseq }
 0xedd   : > { %2023 = vadd.xlane.f32.xlu1 %v2022_v32  ;;  %v3054_v32 = vpack.c.bf16 %v2170_v28, %v2169_v27  ;;  %v2085_v11 = vshrl.u32 %v2084_v24, 7 }
 0xedf   : > { %3055 = vmatpush3.bf16.msra.mxu0 %v3054_v32  ;;  %v2086_v13 = vsub.s32 0, %v2085_v11  ;;  %v2090_v15 = vsub.s32 1, %v2085_v11  ;;  %v2544_v32 = vld [vmem:[%s4852_s19] ss:$0 sm:$0xff] }
 0xee0   : > { %3057 = vmatprep.subr.bf16.mxu0 %v3056_v26 }
 0xee1   : > { %v2087_v17 = vrot.slane %v2082_v14, %v2086_v13  ;;  %v2091_v19 = vrot.slane %v2082_v14, %v2090_v15 }
 0xee3   : > { %3059 = vmatpush3.bf16.msra.mxu0 %v3058_v38 }
 0xee4   : > { %3061 = vmatprep.subr.bf16.mxu0 %v3060_v10 }
 0xee7   : > { %3063 = vmatpush3.bf16.msra.mxu0 %v3062_v43 }
 0xee8   : > { %3065 = vmatprep.subr.bf16.mxu0 %v3064_v44 }
 0xeeb   : > { %3067 = vmatpush3.bf16.msra.mxu0 %v3066_v48 }
 0xeec   : > { %3069 = vmatprep.subr.bf16.mxu0 %v3068_v49 }
 0xeef   : > { %3071 = vmatpush3.bf16.msra.mxu0 %v3070_v34 }
 0xef0   : > { %3073 = vmatprep.subr.bf16.mxu0 %v3072_v54 }
 0xef3   : > { %3075 = vmatpush3.bf16.msra.mxu0 %v3074_v3 }
 0xef4   : > { %3077 = vmatprep.subr.bf16.mxu0 %v3076_v6 }
 0xef7   : > { %3079 = vmatpush3.bf16.msra.mxu0 %v3078_v9 }
 0xf6a   : > { %v2024_v55 = vpop.xlane.xlu1 %2023 }
 0xf6b   : > { %v2025_v56 = vmul.f32 0.007874016, %v2024_v55 }
 0xf6d   : > { %3355 = vrsqrt.f32 %v2025_v56  ;;  %vm2028_vm13 = vcmp.eq.f32.partialorder %v2025_v56, inf  ;;  %v2031_v58 = vand.u32 2147483648, %v2025_v56  ;;  %vm2030_vm14 = vcmp.eq.f32.partialorder %v2025_v56, 0.0 }
 0xf77   : > { %v3356_v16 = vpop.eup %3355 }
 0xf78   : > { %v2027_v57 = vmul.f32 %v3356_v16, %v2025_v56 }
 0xf7a   : > { %v2029_v59 = vsel %vm2028_vm13, %v2025_v56, %v2027_v57 }
 0xf7b   : > { %v2032_v18 = vsel %vm2030_vm14, %v2031_v58, %v2029_v59 }
 0xf7c   : > { %v2033_v21 = vadd.f32 1e-06, %v2032_v18 }
 0xf7e   : > { %3357 = vrcp.f32 %v2033_v21 }
 0xf88   : > { %v3358_v62 = vpop.eup %3357 }
 0xf89   : > { %v2042_v0 = vmul.f32 %v3358_v62, %v2041_v61 }
 0xf8b   : > { %v2049_v1 = vadd.f32 %v2543_v63, %v2042_v0 }
 0xf8d   : > { %2159 = vmatmul.mubr.f32.vlgmr.msra.gmra.mrb[18].mxu1 %v2049_v1 }
0x1060   : > { %v2160_v20 = vpop.f32.mrb[18].mxu1 }
0x1061   : > { %v2161_v23 = vadd.f32 %v2160_v20, %v2087_v17  ;;  %v2162_v25 = vpop.f32.mrb[19].mxu1 }
0x1062   : > { %v2163_v27 = vadd.f32 %v2162_v25, %v2091_v19 }
0x1063   : > { %v2165_v29 = vmax.f32 %v2161_v23, 0.0 }
0x1064   : > { %v2166_v28 = vmax.f32 %v2163_v27, 0.0 }
0x1066   : > { %2270 = vmatprep.mubr.f32.mxu0 %v2166_v28 }
0x1067   : > { %2271 = vmatmul.mubr.f32.vlgmr.msra.gmra.mrb[6].mxu0 %v2165_v29 }
0x113a   : > { %v2677_v31 = vpop.f32.mrb[6].mxu0 }
0x113b   : > { %v2678_v26 = vpop.f32.mrb[7].mxu0 }
0x113c   : > { %v2679_v33 = vadd.f32 %v2678_v26, %v2677_v31 }
0x113e   : > { %v2273_v35 = vadd.f32 %v2679_v33, %v2544_v32 }
0x1140   : > { %v2276_v36 = vadd.f32 %v2273_v35, %v4598_v30 }
0x1142   : > { %2277 = vst [vmem:[%s838_s28] sm:$0xff] %v2276_v36 }
0x1143   : > { %3658 = shalt.err (!%p3655_p7)
}
0x1144   : > { %s3659_s11 = scalar_lea.hbm %s4627_s5, 128  ;;  %s3663_s23 = scalar_lea.hbm %s4853_s12, 512 }
0x1145   : > { %p3660_p2 = scmp.ne.s32.totalorder %s4627_s5, %s3659_s11  ;;  %p3664_p1 = scmp.lt.u32.totalorder %s4627_s5, %s4853_s12 }
0x1146   : > { %p3665_p4 = scmp.lt.u32.totalorder %s3663_s23, %s3659_s11  ;;  %p3667_p6 = scmp.lt.u32.totalorder %s3659_s11, %s4627_s5 }
0x1147   : > { %p3661_p0 = pnand %p3660_p2, %p4854_p10 }
0x1148   : > { %p3666_p9 = por %p3665_p4, %p3664_p1 }
0x1149   : > { %p3662_p11 = pneg %p3661_p0 }
0x114a   : > { %p3668_p3 = por %p3667_p6, %p3666_p9 }
0x114c   : > { %p3669_p8 = pnand %p3668_p3, %p3662_p11 }
0x114e   : > { %3672 = shalt.err (!%p3669_p8)
}
0x114f   : > { %3114 = dma.vmem_to_hbm [thread:$0]  (%p4854_p10), %s4629_s13, 128, %s4627_s5, %s2279_s3  }
0x1150 PF: > { %s4855_s17 = sld [smem:[#allocation32_spill]]  ;;  %p3167_p5 = scmp.ge.s32.totalorder %s3815_s0, 2 }
0x1151   : > { %p4856_p13 = scmp.ne.s32.totalorder %s4808_s9, 0 }
0x1153   : > { %p3149_p12 = pnand %p3167_p5, %p4856_p13 }
0x1156   : > { %s2306_s28 = sand.u32 1, %s4855_s17  }
0x1157   : > { %s2307_s18 = scalar_lea.sflag [#allocation5], %s2306_s28 }
0x1158   : > { %3758 = dma.done.wait (!%p3149_p12), %s2307_s18, 128  }
0x1159   : > { %3760 = vsyncadd (!%p3149_p12), %s2307_s18, 4294967168  ;;  %s43_s0 = sadd.s32 1, %s3815_s0   ;;  %s4858_s1 = sld [smem:[#allocation30_spill]] }
0x115a   : > { %p4658_p7 = scmp.ge.s32.totalorder %s43_s0, 6   ;;  %s4859_s22 = sld [smem:[#allocation31_spill]] }
0x115b   : > { %s4860_s3 = sld [smem:[#allocation33_spill]]  ;;  %s4861_s9 = sld [smem:[#allocation37_spill]] }
0x115c   : > { %s4862_s23 = smov %s4363_s24  ;;  %s4863_s24 = smov %s3779_s2 }
0x115d   : > { %s4864_s2 = smov %s3783_s25  ;;  %s4865_s25 = smov %s4312_s14 }
0x115e   : > { %s4866_s26 = smov %s3795_s27  ;;  %s4867_s27 = smov %s4315_s8 }
0x115f   : > { %s4868_s28 = smov %s3807_s29  ;;  %s4869_s4 = smov %s3811_s30 }
0x1160   : > { %s4870_s29 = smov %s4873_s15  ;;  %42 = sbr.rel (!%p4658_p7) target bundleno = 38 (0x26), region = 197 }
0x1161   : > { %s4871_s30 = smov %s4861_s9 }
0x1167   :  { %2312 = vsyncpa [#allocation4], 1 }
0x1168   :  { %2314 = vsyncpa [#allocation4 + $0x1], 1 }
0x1169   :  { %2315 = vsyncpa [#allocation7], 1 }
0x116a   :  { %2317 = vsyncpa [#allocation7 + $0x1], 1 }
0x116b   :  { %2318 = vsyncpa [#allocation10], 1 }
0x116c   :  { %2319 = vsyncpa [#allocation13], 1 }
0x116d   :  { %2320 = vsyncpa [#allocation16], 1 }
0x116e   :  { %2321 = vsyncpa [#allocation19], 1 }
0x116f   :  { %2322 = vsyncpa [#allocation5], 1 }
0x1170   :  { %2324 = vsyncpa [#allocation5 + $0x1], 1 }

</bundles_post_ra>
